<compile_context>
chip_gen: v7x
topology: tpu7x:2x2x1
jax: 0.10.0
libtpu: 0.0.40
codegen_flags: <defaults>
</compile_context>

<pallas_src>
import jax
import jax.numpy as jnp
from jax.experimental import pallas as pl
from jax.experimental.pallas import tpu as pltpu

IN_DIM = 312
IN_PAD = 384          # 312 padded up to a multiple of 128
H1 = 128
H2 = 64
OUT_DIM = 2
OUT_PAD = 128         # lane-dense output width
LN_EPS = 1e-5


def _layernorm(h, gamma, beta):
    mu = jnp.mean(h, axis=-1, keepdims=True)
    var = jnp.mean((h - mu) * (h - mu), axis=-1, keepdims=True)
    return (h - mu) * jax.lax.rsqrt(var + LN_EPS) * gamma + beta


def encoder_kernel(x_ref,
                   w1_ref, b1_ref, g1_ref, be1_ref,
                   w2_ref, b2_ref, g2_ref, be2_ref,
                   w3_ref, b3_ref,
                   o_ref):
    x = x_ref[...]                                                  # (T, 384)

    # Linear(384->128) + LayerNorm(128) + ReLU   (padded K cols are zeros)
    h = jnp.dot(x, w1_ref[...], preferred_element_type=jnp.float32) + b1_ref[...]
    h = _layernorm(h, g1_ref[...], be1_ref[...])
    h = jnp.maximum(h, 0.0)

    # Linear(128->64) + LayerNorm(64) + ReLU
    h = jnp.dot(h, w2_ref[...], preferred_element_type=jnp.float32) + b2_ref[...]
    h = _layernorm(h, g2_ref[...], be2_ref[...])
    h = jnp.maximum(h, 0.0)

    # Linear(64->128) where columns 2..127 of W/b are zeros -> lane-dense store
    o = jnp.dot(h, w3_ref[...], preferred_element_type=jnp.float32) + b3_ref[...]
    o_ref[...] = o.astype(o_ref.dtype)                              # (T, 128)


def encoder_forward(x, params, *, batch_tile=512):
    """x: (B, 312) f32. Returns (B, 2) f32."""
    (w1, b1, g1, be1, w2, b2, g2, be2, w3, b3) = params
    B = x.shape[0]

    # --- host-side (XLA) padding: zeros never change the result ----------
    x_p = jnp.pad(x, ((0, 0), (0, IN_PAD - IN_DIM)))                # (B, 384)
    w1_p = jnp.pad(w1, ((0, IN_PAD - IN_DIM), (0, 0)))              # (384, 128)
    w3_p = jnp.pad(w3, ((0, 0), (0, OUT_PAD - OUT_DIM)))            # (64, 128)
    b3_p = jnp.pad(b3, ((0, 0), (0, OUT_PAD - OUT_DIM)))            # (1, 128)

    # --- batch tiling: 256-aligned tiles, remainder handled by padding ---
    tile = min(batch_tile, pl.cdiv(B, 256) * 256)   # don't over-pad tiny batches
    tile = max(tile, 256)
    n_tiles = pl.cdiv(B, tile)
    B_pad = n_tiles * tile
    if B_pad != B:
        x_p = jnp.pad(x_p, ((0, B_pad - B), (0, 0)))

    full = lambda shape: pl.BlockSpec(shape, lambda i: (0,) * len(shape))

    weight_bytes = 4 * (IN_PAD * H1 + 3 * H1 + H1 * H2 + 3 * H2
                        + H2 * OUT_PAD + OUT_PAD)
    cost = pl.CostEstimate(
        flops=2 * B_pad * (IN_PAD * H1 + H1 * H2 + H2 * OUT_PAD),
        transcendentals=2 * B_pad,                      # one rsqrt per LN row
        bytes_accessed=4 * B_pad * (IN_PAD + OUT_PAD) + weight_bytes,
    )

    out = pl.pallas_call(
        encoder_kernel,
        out_shape=jax.ShapeDtypeStruct((B_pad, OUT_PAD), jnp.float32),
        grid=(n_tiles,),
        in_specs=[
            pl.BlockSpec((tile, IN_PAD), lambda i: (i, 0)),          # x tile
            full((IN_PAD, H1)), full((1, H1)), full((1, H1)), full((1, H1)),
            full((H1, H2)),     full((1, H2)), full((1, H2)), full((1, H2)),
            full((H2, OUT_PAD)), full((1, OUT_PAD)),
        ],
        out_specs=pl.BlockSpec((tile, OUT_PAD), lambda i: (i, 0)),
        compiler_params=pltpu.CompilerParams(
            dimension_semantics=("parallel",)),
        cost_estimate=cost,
    )(x_p, w1_p, b1, g1, be1, w2, b2, g2, be2, w3_p, b3_p)

    return out[:B, :OUT_DIM]


def init_params(key):
    """Deterministic synthetic parameters matching the module's shapes.

    PyTorch Linear stores W as (out, in); we store W as (in, out) so the
    kernel does x @ W.  LayerNorm initialized like PyTorch defaults
    (gamma=1, beta=0).  Biases are kept 2-D (1, out) for TPU layout."""
    ks = jax.random.split(key, 3)

    def lin(k, fan_in, fan_out):
        bound = 1.0 / jnp.sqrt(fan_in)
        w = jax.random.uniform(k, (fan_in, fan_out), jnp.float32, -bound, bound)
        b = jax.random.uniform(jax.random.fold_in(k, 1), (1, fan_out),
                               jnp.float32, -bound, bound)
        return w, b

    w1, b1 = lin(ks[0], IN_DIM, H1)
    w2, b2 = lin(ks[1], H1, H2)
    w3, b3 = lin(ks[2], H2, OUT_DIM)
    g1, be1 = jnp.ones((1, H1), jnp.float32), jnp.zeros((1, H1), jnp.float32)
    g2, be2 = jnp.ones((1, H2), jnp.float32), jnp.zeros((1, H2), jnp.float32)
    return (w1, b1, g1, be1, w2, b2, g2, be2, w3, b3)


def encoder_reference(x, params):
    """Pure-JAX reference of the PyTorch forward for validation."""
    (w1, b1, g1, be1, w2, b2, g2, be2, w3, b3) = params
    h = x @ w1 + b1
    h = _layernorm(h, g1, be1)
    h = jnp.maximum(h, 0.0)
    h = h @ w2 + b2
    h = _layernorm(h, g2, be2)
    h = jnp.maximum(h, 0.0)
    return h @ w3 + b3


if __name__ == "__main__":
    key = jax.random.PRNGKey(0)
    k_x, k_p = jax.random.split(key)
    params = init_params(k_p)

    # Small primary check (pads to one 256-row tile) + a multi-tile /
    # remainder check (520 -> two 512-row grid steps with a padded tail).
    for batch in (8, 520):
        x = jax.random.normal(jax.random.fold_in(k_x, batch),
                              (batch, IN_DIM), jnp.float32)
        out = jax.block_until_ready(encoder_forward(x, params))
        ref = encoder_reference(x, params)
        assert out.shape == (batch, OUT_DIM)
        assert jnp.allclose(out, ref, atol=1e-4, rtol=1e-4), (
            f"batch={batch}: max abs err {jnp.max(jnp.abs(out - ref))}")

    # note: `self.ref` parameter and `rnd()` sampling are not part of forward();
    # TODO(synk): rnd() (Bernoulli/Normal mixture sampling) intentionally not ported.
    print("KERNEL_OK")
</pallas_src>

<mosaic_0001>
module attributes {stable_mosaic.version = 11 : i64} {
  func.func @encoder_kernel(%arg0: i32, %arg1: memref<256x384xf32, #tpu.memory_space<vmem>>, %arg2: memref<384x128xf32, #tpu.memory_space<vmem>>, %arg3: memref<1x128xf32, #tpu.memory_space<vmem>>, %arg4: memref<1x128xf32, #tpu.memory_space<vmem>>, %arg5: memref<1x128xf32, #tpu.memory_space<vmem>>, %arg6: memref<128x64xf32, #tpu.memory_space<vmem>>, %arg7: memref<1x64xf32, #tpu.memory_space<vmem>>, %arg8: memref<1x64xf32, #tpu.memory_space<vmem>>, %arg9: memref<1x64xf32, #tpu.memory_space<vmem>>, %arg10: memref<64x128xf32, #tpu.memory_space<vmem>>, %arg11: memref<1x128xf32, #tpu.memory_space<vmem>>, %arg12: memref<256x128xf32, #tpu.memory_space<vmem>>) attributes {dimension_semantics = [#tpu.dimension_semantics<parallel>], iteration_bounds = array<i64: 1>, scalar_prefetch = 0 : i64, scratch_operands = 0 : i64, tpu.core_type = #tpu.core_type<tc>, window_params = [{transform_indices = @transform_0, window_bounds = array<i64: 256, 384>}, {pipeline_mode = #tpu.pipeline_mode<synchronous>, transform_indices = @transform_1, window_bounds = array<i64: 384, 128>}, {pipeline_mode = #tpu.pipeline_mode<synchronous>, transform_indices = @transform_2, window_bounds = array<i64: 1, 128>}, {pipeline_mode = #tpu.pipeline_mode<synchronous>, transform_indices = @transform_3, window_bounds = array<i64: 1, 128>}, {pipeline_mode = #tpu.pipeline_mode<synchronous>, transform_indices = @transform_4, window_bounds = array<i64: 1, 128>}, {pipeline_mode = #tpu.pipeline_mode<synchronous>, transform_indices = @transform_5, window_bounds = array<i64: 128, 64>}, {pipeline_mode = #tpu.pipeline_mode<synchronous>, transform_indices = @transform_6, window_bounds = array<i64: 1, 64>}, {pipeline_mode = #tpu.pipeline_mode<synchronous>, transform_indices = @transform_7, window_bounds = array<i64: 1, 64>}, {pipeline_mode = #tpu.pipeline_mode<synchronous>, transform_indices = @transform_8, window_bounds = array<i64: 1, 64>}, {pipeline_mode = #tpu.pipeline_mode<synchronous>, transform_indices = @transform_9, window_bounds = array<i64: 64, 128>}, {pipeline_mode = #tpu.pipeline_mode<synchronous>, transform_indices = @transform_10, window_bounds = array<i64: 1, 128>}, {transform_indices = @transform_11, window_bounds = array<i64: 256, 128>}]} {
    %c0 = arith.constant 0 : index
    %c0_0 = arith.constant 0 : index
    %0 = vector.load %arg1[%c0, %c0_0] : memref<256x384xf32, #tpu.memory_space<vmem>>, vector<256x384xf32>
    %c0_1 = arith.constant 0 : index
    %c0_2 = arith.constant 0 : index
    %1 = vector.load %arg2[%c0_1, %c0_2] : memref<384x128xf32, #tpu.memory_space<vmem>>, vector<384x128xf32>
    %cst = arith.constant dense<0.000000e+00> : vector<256x128xf32>
    %2 = tpu.matmul %0, %1, %cst {dimension_numbers = #tpu.dot_dimension_numbers<[1], [0], [0], [1], [0, 0, 1, 1], [], []>} : vector<256x384xf32>, vector<384x128xf32>, vector<256x128xf32> -> vector<256x128xf32>
    %c0_3 = arith.constant 0 : index
    %c0_4 = arith.constant 0 : index
    %3 = vector.load %arg3[%c0_3, %c0_4] : memref<1x128xf32, #tpu.memory_space<vmem>>, vector<1x128xf32>
    %4 = vector.broadcast %3 : vector<1x128xf32> to vector<256x128xf32>
    %5 = arith.addf %2, %4 : vector<256x128xf32>
    %c0_5 = arith.constant 0 : index
    %c0_6 = arith.constant 0 : index
    %6 = vector.load %arg4[%c0_5, %c0_6] : memref<1x128xf32, #tpu.memory_space<vmem>>, vector<1x128xf32>
    %c0_7 = arith.constant 0 : index
    %c0_8 = arith.constant 0 : index
    %7 = vector.load %arg5[%c0_7, %c0_8] : memref<1x128xf32, #tpu.memory_space<vmem>>, vector<1x128xf32>
    %cst_9 = arith.constant dense<0.000000e+00> : vector<256xf32>
    %8 = vector.multi_reduction <add>, %5, %cst_9 [1] : vector<256x128xf32> to vector<256xf32>
    %9 = vector.shape_cast %8 : vector<256xf32> to vector<256x1xf32>
    %cst_10 = arith.constant 1.280000e+02 : f32
    %10 = vector.broadcast %cst_10 : f32 to vector<256x1xf32>
    %11 = arith.divf %9, %10 : vector<256x1xf32>
    %12 = vector.broadcast %11 : vector<256x1xf32> to vector<256x128xf32>
    %13 = arith.subf %5, %12 : vector<256x128xf32>
    %14 = vector.broadcast %11 : vector<256x1xf32> to vector<256x128xf32>
    %15 = arith.subf %5, %14 : vector<256x128xf32>
    %16 = arith.mulf %13, %15 : vector<256x128xf32>
    %cst_11 = arith.constant dense<0.000000e+00> : vector<256xf32>
    %17 = vector.multi_reduction <add>, %16, %cst_11 [1] : vector<256x128xf32> to vector<256xf32>
    %18 = vector.shape_cast %17 : vector<256xf32> to vector<256x1xf32>
    %cst_12 = arith.constant 1.280000e+02 : f32
    %19 = vector.broadcast %cst_12 : f32 to vector<256x1xf32>
    %20 = arith.divf %18, %19 : vector<256x1xf32>
    %21 = vector.broadcast %11 : vector<256x1xf32> to vector<256x128xf32>
    %22 = arith.subf %5, %21 : vector<256x128xf32>
    %cst_13 = arith.constant 9.99999974E-6 : f32
    %23 = vector.broadcast %cst_13 : f32 to vector<256x1xf32>
    %24 = arith.addf %20, %23 : vector<256x1xf32>
    %25 = math.rsqrt %24 : vector<256x1xf32>
    %26 = vector.broadcast %25 : vector<256x1xf32> to vector<256x128xf32>
    %27 = arith.mulf %22, %26 : vector<256x128xf32>
    %28 = vector.broadcast %6 : vector<1x128xf32> to vector<256x128xf32>
    %29 = arith.mulf %27, %28 : vector<256x128xf32>
    %30 = vector.broadcast %7 : vector<1x128xf32> to vector<256x128xf32>
    %31 = arith.addf %29, %30 : vector<256x128xf32>
    %cst_14 = arith.constant 0.000000e+00 : f32
    %32 = vector.broadcast %cst_14 : f32 to vector<256x128xf32>
    %33 = arith.maximumf %31, %32 : vector<256x128xf32>
    %c0_15 = arith.constant 0 : index
    %c0_16 = arith.constant 0 : index
    %34 = vector.load %arg6[%c0_15, %c0_16] : memref<128x64xf32, #tpu.memory_space<vmem>>, vector<128x64xf32>
    %cst_17 = arith.constant dense<0.000000e+00> : vector<256x64xf32>
    %35 = tpu.matmul %33, %34, %cst_17 {dimension_numbers = #tpu.dot_dimension_numbers<[1], [0], [0], [1], [0, 0, 1, 1], [], []>} : vector<256x128xf32>, vector<128x64xf32>, vector<256x64xf32> -> vector<256x64xf32>
    %c0_18 = arith.constant 0 : index
    %c0_19 = arith.constant 0 : index
    %36 = vector.load %arg7[%c0_18, %c0_19] : memref<1x64xf32, #tpu.memory_space<vmem>>, vector<1x64xf32>
    %37 = vector.broadcast %36 : vector<1x64xf32> to vector<256x64xf32>
    %38 = arith.addf %35, %37 : vector<256x64xf32>
    %c0_20 = arith.constant 0 : index
    %c0_21 = arith.constant 0 : index
    %39 = vector.load %arg8[%c0_20, %c0_21] : memref<1x64xf32, #tpu.memory_space<vmem>>, vector<1x64xf32>
    %c0_22 = arith.constant 0 : index
    %c0_23 = arith.constant 0 : index
    %40 = vector.load %arg9[%c0_22, %c0_23] : memref<1x64xf32, #tpu.memory_space<vmem>>, vector<1x64xf32>
    %cst_24 = arith.constant dense<0.000000e+00> : vector<256xf32>
    %41 = vector.multi_reduction <add>, %38, %cst_24 [1] : vector<256x64xf32> to vector<256xf32>
    %42 = vector.shape_cast %41 : vector<256xf32> to vector<256x1xf32>
    %cst_25 = arith.constant 6.400000e+01 : f32
    %43 = vector.broadcast %cst_25 : f32 to vector<256x1xf32>
    %44 = arith.divf %42, %43 : vector<256x1xf32>
    %45 = vector.broadcast %44 : vector<256x1xf32> to vector<256x64xf32>
    %46 = arith.subf %38, %45 : vector<256x64xf32>
    %47 = vector.broadcast %44 : vector<256x1xf32> to vector<256x64xf32>
    %48 = arith.subf %38, %47 : vector<256x64xf32>
    %49 = arith.mulf %46, %48 : vector<256x64xf32>
    %cst_26 = arith.constant dense<0.000000e+00> : vector<256xf32>
    %50 = vector.multi_reduction <add>, %49, %cst_26 [1] : vector<256x64xf32> to vector<256xf32>
    %51 = vector.shape_cast %50 : vector<256xf32> to vector<256x1xf32>
    %cst_27 = arith.constant 6.400000e+01 : f32
    %52 = vector.broadcast %cst_27 : f32 to vector<256x1xf32>
    %53 = arith.divf %51, %52 : vector<256x1xf32>
    %54 = vector.broadcast %44 : vector<256x1xf32> to vector<256x64xf32>
    %55 = arith.subf %38, %54 : vector<256x64xf32>
    %cst_28 = arith.constant 9.99999974E-6 : f32
    %56 = vector.broadcast %cst_28 : f32 to vector<256x1xf32>
    %57 = arith.addf %53, %56 : vector<256x1xf32>
    %58 = math.rsqrt %57 : vector<256x1xf32>
    %59 = vector.broadcast %58 : vector<256x1xf32> to vector<256x64xf32>
    %60 = arith.mulf %55, %59 : vector<256x64xf32>
    %61 = vector.broadcast %39 : vector<1x64xf32> to vector<256x64xf32>
    %62 = arith.mulf %60, %61 : vector<256x64xf32>
    %63 = vector.broadcast %40 : vector<1x64xf32> to vector<256x64xf32>
    %64 = arith.addf %62, %63 : vector<256x64xf32>
    %cst_29 = arith.constant 0.000000e+00 : f32
    %65 = vector.broadcast %cst_29 : f32 to vector<256x64xf32>
    %66 = arith.maximumf %64, %65 : vector<256x64xf32>
    %c0_30 = arith.constant 0 : index
    %c0_31 = arith.constant 0 : index
    %67 = vector.load %arg10[%c0_30, %c0_31] : memref<64x128xf32, #tpu.memory_space<vmem>>, vector<64x128xf32>
    %cst_32 = arith.constant dense<0.000000e+00> : vector<256x128xf32>
    %68 = tpu.matmul %66, %67, %cst_32 {dimension_numbers = #tpu.dot_dimension_numbers<[1], [0], [0], [1], [0, 0, 1, 1], [], []>} : vector<256x64xf32>, vector<64x128xf32>, vector<256x128xf32> -> vector<256x128xf32>
    %c0_33 = arith.constant 0 : index
    %c0_34 = arith.constant 0 : index
    %69 = vector.load %arg11[%c0_33, %c0_34] : memref<1x128xf32, #tpu.memory_space<vmem>>, vector<1x128xf32>
    %70 = vector.broadcast %69 : vector<1x128xf32> to vector<256x128xf32>
    %71 = arith.addf %68, %70 : vector<256x128xf32>
    %c0_35 = arith.constant 0 : index
    %c0_36 = arith.constant 0 : index
    %72 = vector.load %arg12[%c0_35, %c0_36] : memref<256x128xf32, #tpu.memory_space<vmem>>, vector<256x128xf32>
    tpu.vector_store %arg12[%c0_35, %c0_36], %71 {strides = array<i32>} : memref<256x128xf32, #tpu.memory_space<vmem>>, vector<256x128xf32>,
    return
  }
  func.func @transform_0(%arg0: i32) -> (i32, i32) {
    %c0_i32 = arith.constant 0 : i32
    %c0_i32_0 = arith.constant 0 : i32
    return %arg0, %c0_i32 : i32, i32
  }
  func.func @transform_1(%arg0: i32) -> (i32, i32) {
    %c0_i32 = arith.constant 0 : i32
    %c0_i32_0 = arith.constant 0 : i32
    %c0_i32_1 = arith.constant 0 : i32
    return %c0_i32, %c0_i32_0 : i32, i32
  }
  func.func @transform_2(%arg0: i32) -> (i32, i32) {
    %c0_i32 = arith.constant 0 : i32
    %c0_i32_0 = arith.constant 0 : i32
    %c0_i32_1 = arith.constant 0 : i32
    return %c0_i32, %c0_i32_0 : i32, i32
  }
  func.func @transform_3(%arg0: i32) -> (i32, i32) {
    %c0_i32 = arith.constant 0 : i32
    %c0_i32_0 = arith.constant 0 : i32
    %c0_i32_1 = arith.constant 0 : i32
    return %c0_i32, %c0_i32_0 : i32, i32
  }
  func.func @transform_4(%arg0: i32) -> (i32, i32) {
    %c0_i32 = arith.constant 0 : i32
    %c0_i32_0 = arith.constant 0 : i32
    %c0_i32_1 = arith.constant 0 : i32
    return %c0_i32, %c0_i32_0 : i32, i32
  }
  func.func @transform_5(%arg0: i32) -> (i32, i32) {
    %c0_i32 = arith.constant 0 : i32
    %c0_i32_0 = arith.constant 0 : i32
    %c0_i32_1 = arith.constant 0 : i32
    return %c0_i32, %c0_i32_0 : i32, i32
  }
  func.func @transform_6(%arg0: i32) -> (i32, i32) {
    %c0_i32 = arith.constant 0 : i32
    %c0_i32_0 = arith.constant 0 : i32
    %c0_i32_1 = arith.constant 0 : i32
    return %c0_i32, %c0_i32_0 : i32, i32
  }
  func.func @transform_7(%arg0: i32) -> (i32, i32) {
    %c0_i32 = arith.constant 0 : i32
    %c0_i32_0 = arith.constant 0 : i32
    %c0_i32_1 = arith.constant 0 : i32
    return %c0_i32, %c0_i32_0 : i32, i32
  }
  func.func @transform_8(%arg0: i32) -> (i32, i32) {
    %c0_i32 = arith.constant 0 : i32
    %c0_i32_0 = arith.constant 0 : i32
    %c0_i32_1 = arith.constant 0 : i32
    return %c0_i32, %c0_i32_0 : i32, i32
  }
  func.func @transform_9(%arg0: i32) -> (i32, i32) {
    %c0_i32 = arith.constant 0 : i32
    %c0_i32_0 = arith.constant 0 : i32
    %c0_i32_1 = arith.constant 0 : i32
    return %c0_i32, %c0_i32_0 : i32, i32
  }
  func.func @transform_10(%arg0: i32) -> (i32, i32) {
    %c0_i32 = arith.constant 0 : i32
    %c0_i32_0 = arith.constant 0 : i32
    %c0_i32_1 = arith.constant 0 : i32
    return %c0_i32, %c0_i32_0 : i32, i32
  }
  func.func @transform_11(%arg0: i32) -> (i32, i32) {
    %c0_i32 = arith.constant 0 : i32
    %c0_i32_0 = arith.constant 0 : i32
    return %arg0, %c0_i32 : i32, i32
  }
}

</mosaic_0001>

<bundles_post_ra>
// kernel: tpu_custom_call.1
= control target key start
LH: loop header
LB: loop body
LE: loop exit
PB: predicated region body
PF: predicated region fallthrough
CT: control target
= control target key end

     0   :  { %16 = vsyncpa [#allocation3], 0  ;;  %s4296_s0 = inlined_call_operand.hbm [shape: f32[256,384], index: 0, kind: input, shape index: {}]   ;;  %s4297_s1 = inlined_call_operand.hbm [shape: f32[384,128], index: 1, kind: input, shape index: {}]   ;;  %s4298_s2 = inlined_call_operand.vmem [shape: f32[1,128], index: 2, kind: input, shape index: {}]   ;;  %s4299_s3 = inlined_call_operand.vmem [shape: f32[1,128], index: 3, kind: input, shape index: {}]   ;;  %s4300_s4 = inlined_call_operand.vmem [shape: f32[1,128], index: 4, kind: input, shape index: {}]   ;;  %s4301_s5 = inlined_call_operand.vmem [shape: f32[128,64], index: 5, kind: input, shape index: {}]   ;;  %s4302_s6 = inlined_call_operand.vmem [shape: f32[1,64], index: 6, kind: input, shape index: {}]   ;;  %s4303_s7 = inlined_call_operand.vmem [shape: f32[1,64], index: 7, kind: input, shape index: {}]   ;;  %s4304_s8 = inlined_call_operand.vmem [shape: f32[1,64], index: 8, kind: input, shape index: {}]   ;;  %s4305_s9 = inlined_call_operand.vmem [shape: f32[64,128], index: 9, kind: input, shape index: {}]   ;;  %s4306_s10 = inlined_call_operand.vmem [shape: f32[1,128], index: 10, kind: input, shape index: {}]   ;;  %s4307_s11 = inlined_call_operand.hbm [shape: f32[256,128], index: 11, kind: output, shape index: {}]  }
   0x1   :  { %17 = vsyncpa [#allocation6], 0 }
   0x2   :  { %18 = vsyncpa [#allocation4], 0  ;;  %s3044_s17 = smov [#allocation2]   ;;  %s2972_s21 = scalar_lea.hbm %s4296_s0, 12288 }
   0x3   :  { %s24_s18 = sshll.u32 %s3044_s17, 4  ;;  %p2973_p0 = scmp.ne.s32.totalorder %s4296_s0, %s2972_s21  ;;  %s25_s18 = int_to_ptr.vmem [resolvable:$true] %s24_s18 }
   0x4   :  { %p2976_p1 = scmp.lt.u32.totalorder %s2972_s21, %s4296_s0 }
   0x6   :  { %p2978_p2 = pnand %p2976_p1, %p2973_p0 }
   0x8   :  { %2981 = shalt.err (!%p2978_p2)
}
   0x9   :  { %s2982_s26 = scalar_lea.vmem %s25_s18, 12288  ;;  %p2987_p4 = scmp.lt.s32.totalorder %s25_s18, %s25_s18 }
   0xa   :  { %p2983_p3 = scmp.ne.s32.totalorder %s25_s18, %s2982_s26  ;;  %p2988_p5 = scmp.lt.s32.totalorder %s2982_s26, %s2982_s26 }
   0xc   :  { %p2989_p6 = por %p2988_p5, %p2987_p4 }
   0xe   :  { %p2990_p7 = pnand %p2989_p6, %p2983_p3 }
  0x10   :  { %2993 = shalt.err (!%p2990_p7)
}
  0x11   :  { %s3045_s27 = smov 384   ;;  %s3046_s28 = smov 24  }
  0x12   :  { %30 = dma.hbm_to_vmem [thread:$0]  %s4296_s0, 12288, %s25_s18, [#allocation3], %s3045_s27, %s3045_s27, %s3046_s28  }
  0x13   :  { %s3047_s12 = smov [#allocation5]   ;;  %s2994_s16 = scalar_lea.hbm %s4297_s1, 6144 }
  0x14   :  { %s36_s13 = sshll.u32 %s3047_s12, 4  ;;  %p2995_p8 = scmp.ne.s32.totalorder %s4297_s1, %s2994_s16  ;;  %s37_s13 = int_to_ptr.vmem [resolvable:$true] %s36_s13 }
  0x15   :  { %p2998_p9 = scmp.lt.u32.totalorder %s2994_s16, %s4297_s1 }
  0x17   :  { %p3000_p10 = pnand %p2998_p9, %p2995_p8 }
  0x19   :  { %3003 = shalt.err (!%p3000_p10)
}
  0x1a   :  { %s3004_s22 = scalar_lea.vmem %s37_s13, 6144  ;;  %p3009_p12 = scmp.lt.s32.totalorder %s37_s13, %s37_s13 }
  0x1b   :  { %p3005_p11 = scmp.ne.s32.totalorder %s37_s13, %s3004_s22  ;;  %p3010_p13 = scmp.lt.s32.totalorder %s3004_s22, %s3004_s22 }
  0x1d   :  { %p3011_p0 = por %p3010_p13, %p3009_p12 }
  0x1f   :  { %p3012_p1 = pnand %p3011_p0, %p3005_p11 }
  0x21   :  { %3015 = shalt.err (!%p3012_p1)
}
  0x22   :  { %s3048_s0 = smov 128   ;;  %s3049_s18 = smov 8  }
  0x23   :  { %42 = dma.hbm_to_vmem [thread:$0]  %s4297_s1, 6144, %s37_s13, [#allocation6], %s3048_s0, %s3048_s0, %s3049_s18  }
  0x24   :  { %3038 = dma.done.wait [#allocation3], 12288  }
  0x25   :  { %3039 = vsyncadd [#allocation3], 4294955008 }
  0x26   :  { %3040 = dma.done.wait [#allocation6], 6144  }
  0x27   :  { %3041 = vsyncadd [#allocation6], 4294961152  ;;  %v3050_v0 = vmov 0.0|0.0   ;;  %v163_v1 = vld [vmem:[#allocation5] sm:$0xff]  ;;  %v164_v2 = vld [vmem:[#allocation5 + $0x8] sm:$0xff]  ;;  %vm1381_vm0 = vcmask 523264  }
  0x28   :  { %2692 = vmatprep.subr.bf16.mxu0 %v3050_v0  ;;  %v165_v3 = vld [vmem:[#allocation5 + $0x10] sm:$0xff]  ;;  %v2693_v4 = vpack.c.bf16 %v164_v2, %v163_v1  ;;  %v166_v5 = vld [vmem:[#allocation5 + $0x18] sm:$0xff]  ;;  %v167_v7 = vld [vmem:[#allocation5 + $0x20] sm:$0xff] }
  0x29   :  { %v2696_v6 = vpack.c.bf16 %v166_v5, %v165_v3  ;;  %v168_v8 = vld [vmem:[#allocation5 + $0x28] sm:$0xff]  ;;  %v169_v10 = vld [vmem:[#allocation5 + $0x30] sm:$0xff]  ;;  %v170_v11 = vld [vmem:[#allocation5 + $0x38] sm:$0xff] }
  0x2a   :  { %2694 = vmatpush1.bf16.msra.mxu0 %v2693_v4  ;;  %v2699_v9 = vpack.c.bf16 %v168_v8, %v167_v7  ;;  %v68_v12 = vld [vmem:[#allocation2 + $0x8] sm:$0xff]  ;;  %v2702_v13 = vpack.c.bf16 %v170_v11, %v169_v10  ;;  %v195_v14 = vld [vmem:[#allocation5 + $0x100] sm:$0xff]  ;;  %v197_v19 = vld [vmem:[#allocation5 + $0x110] sm:$0xff] }
  0x2b   :  { %2695 = vmatprep.subr.bf16.mxu0 %v3050_v0  ;;  %282 = vmatprep.mubr.f32.mxu0 %v68_v12  ;;  %v196_v15 = vld [vmem:[#allocation5 + $0x108] sm:$0xff]  ;;  %v171_v16 = vld [vmem:[#allocation5 + $0x40] sm:$0xff]  ;;  %v198_v20 = vld [vmem:[#allocation5 + $0x118] sm:$0xff] }
  0x2c   :  { %v172_v17 = vld [vmem:[#allocation5 + $0x48] sm:$0xff]  ;;  %v3143_v18 = vpack.c.bf16 %v196_v15, %v195_v14  ;;  %v3146_v21 = vpack.c.bf16 %v198_v20, %v197_v19  ;;  %v199_v22 = vld [vmem:[#allocation5 + $0x120] sm:$0xff]  ;;  %v173_v25 = vld [vmem:[#allocation5 + $0x50] sm:$0xff] }
  0x2d   :  { %v200_v23 = vld [vmem:[#allocation5 + $0x128] sm:$0xff]  ;;  %v2705_v24 = vpack.c.bf16 %v172_v17, %v171_v16  ;;  %v174_v26 = vld [vmem:[#allocation5 + $0x58] sm:$0xff]  ;;  %v201_v28 = vld [vmem:[#allocation5 + $0x130] sm:$0xff] }
  0x2e   :  { %2697 = vmatpush1.bf16.msra.mxu0 %v2696_v6  ;;  %2820 = vmatprep.subr.bf16.mxu1 %v3143_v18  ;;  %v3151_v27 = vpack.c.bf16 %v200_v23, %v199_v22  ;;  %v202_v29 = vld [vmem:[#allocation5 + $0x138] sm:$0xff]  ;;  %v2708_v30 = vpack.c.bf16 %v174_v26, %v173_v25  ;;  %v175_v31 = vld [vmem:[#allocation5 + $0x60] sm:$0xff]  ;;  %v176_v32 = vld [vmem:[#allocation5 + $0x68] sm:$0xff] }
  0x2f   :  { %2698 = vmatprep.subr.bf16.mxu0 %v3050_v0  ;;  %2828 = vmatpush3.bf16.msra.mxu1 %v3143_v18  ;;  %v3156_v33 = vpack.c.bf16 %v202_v29, %v201_v28  ;;  %v203_v34 = vld [vmem:[#allocation5 + $0x140] sm:$0xff]  ;;  %v204_v35 = vld [vmem:[#allocation5 + $0x148] sm:$0xff]  ;;  %v93_v36 = vld [vmem:[#allocation2 + $0xd0] sm:$0xff]  ;;  %v2711_v37 = vpack.c.bf16 %v176_v32, %v175_v31 }
  0x30   :  { %2821 = vmatprep.subr.bf16.mxu1 %v3146_v21  ;;  %v177_v38 = vld [vmem:[#allocation5 + $0x70] sm:$0xff]  ;;  %v178_v39 = vld [vmem:[#allocation5 + $0x78] sm:$0xff]  ;;  %v3161_v40 = vpack.c.bf16 %v204_v35, %v203_v34  ;;  %2512 = vmatprep.mubr.f32.mxu1 %v93_v36  ;;  %v179_v44 = vld [vmem:[#allocation5 + $0x80] sm:$0xff] }
  0x31   :  { %v205_v41 = vld [vmem:[#allocation5 + $0x150] sm:$0xff]  ;;  %v206_v42 = vld [vmem:[#allocation5 + $0x158] sm:$0xff]  ;;  %v2714_v43 = vpack.c.bf16 %v178_v39, %v177_v38  ;;  %v180_v45 = vld [vmem:[#allocation5 + $0x88] sm:$0xff] }
  0x32   :  { %2700 = vmatpush1.bf16.msra.mxu0 %v2699_v9  ;;  %v3166_v46 = vpack.c.bf16 %v206_v42, %v205_v41  ;;  %v207_v47 = vld [vmem:[#allocation5 + $0x160] sm:$0xff]  ;;  %v208_v48 = vld [vmem:[#allocation5 + $0x168] sm:$0xff]  ;;  %v2717_v49 = vpack.c.bf16 %v180_v45, %v179_v44  ;;  %v181_v50 = vld [vmem:[#allocation5 + $0x90] sm:$0xff] }
  0x33   :  { %2701 = vmatprep.subr.bf16.mxu0 %v3050_v0  ;;  %2829 = vmatpush3.bf16.msra.mxu1 %v3146_v21  ;;  %v182_v51 = vld [vmem:[#allocation5 + $0x98] sm:$0xff]  ;;  %v3171_v52 = vpack.c.bf16 %v208_v48, %v207_v47  ;;  %v209_v53 = vld [vmem:[#allocation5 + $0x170] sm:$0xff]  ;;  %v183_v56 = vld [vmem:[#allocation5 + $0xa0] sm:$0xff] }
  0x34   :  { %2822 = vmatprep.subr.bf16.mxu1 %v3151_v27  ;;  %v210_v54 = vld [vmem:[#allocation5 + $0x178] sm:$0xff]  ;;  %v2720_v55 = vpack.c.bf16 %v182_v51, %v181_v50  ;;  %v184_v57 = vld [vmem:[#allocation5 + $0xa8] sm:$0xff]  ;;  %v185_v60 = vld [vmem:[#allocation5 + $0xb0] sm:$0xff] }
  0x35   :  { %v3176_v58 = vpack.c.bf16 %v210_v54, %v209_v53  ;;  %v2723_v59 = vpack.c.bf16 %v184_v57, %v183_v56  ;;  %v186_v61 = vld [vmem:[#allocation5 + $0xb8] sm:$0xff]  ;;  %v96_v63 = vld [vmem:[#allocation2 + $0xe8] sm:$0xff]  ;;  %v187_v1 = vld [vmem:[#allocation5 + $0xc0] sm:$0xff] }
  0x36   :  { %2703 = vmatpush1.bf16.msra.mxu0 %v2702_v13  ;;  %v2726_v62 = vpack.c.bf16 %v186_v61, %v185_v60  ;;  %v188_v2 = vld [vmem:[#allocation5 + $0xc8] sm:$0xff]  ;;  %v99_v3 = vld [vmem:[#allocation2 + $0x100] sm:$0xff]  ;;  %v102_v5 = vld [vmem:[#allocation2 + $0x118] sm:$0xff] }
  0x37   :  { %2704 = vmatprep.subr.bf16.mxu0 %v3050_v0  ;;  %2830 = vmatpush3.bf16.msra.mxu1 %v3151_v27  ;;  %v2729_v4 = vpack.c.bf16 %v188_v2, %v187_v1  ;;  %v189_v6 = vld [vmem:[#allocation5 + $0xd0] sm:$0xff]  ;;  %v190_v7 = vld [vmem:[#allocation5 + $0xd8] sm:$0xff]  ;;  %v108_v10 = vld [vmem:[#allocation2 + $0x148] sm:$0xff] }
  0x38   :  { %2823 = vmatprep.subr.bf16.mxu1 %v3156_v33  ;;  %v105_v8 = vld [vmem:[#allocation2 + $0x130] sm:$0xff]  ;;  %v2732_v9 = vpack.c.bf16 %v190_v7, %v189_v6  ;;  %v191_v11 = vld [vmem:[#allocation5 + $0xe0] sm:$0xff]  ;;  %v192_v12 = vld [vmem:[#allocation5 + $0xe8] sm:$0xff] }
  0x39   :  { %v111_v13 = vld [vmem:[#allocation2 + $0x160] sm:$0xff]  ;;  %v2735_v14 = vpack.c.bf16 %v192_v12, %v191_v11  ;;  %v114_v15 = vld [vmem:[#allocation2 + $0x178] sm:$0xff]  ;;  %v193_v16 = vld [vmem:[#allocation5 + $0xf0] sm:$0xff] }
  0x3a   :  { %2706 = vmatpush1.bf16.msra.mxu0 %v2705_v24  ;;  %v194_v17 = vld [vmem:[#allocation5 + $0xf8] sm:$0xff]  ;;  %v117_v19 = vld [vmem:[#allocation2 + $0x190] sm:$0xff]  ;;  %v120_v22 = vld [vmem:[#allocation2 + $0x1a8] sm:$0xff] }
  0x3b   :  { %2707 = vmatprep.subr.bf16.mxu0 %v3050_v0  ;;  %2831 = vmatpush3.bf16.msra.mxu1 %v3156_v33  ;;  %v2738_v20 = vpack.c.bf16 %v194_v17, %v193_v16  ;;  %v123_v23 = vld [vmem:[#allocation2 + $0x1c0] sm:$0xff]  ;;  %v126_v25 = vld [vmem:[#allocation2 + $0x1d8] sm:$0xff]  ;;  %v129_v28 = vld [vmem:[#allocation2 + $0x1f0] sm:$0xff] }
  0x3c   :  { %2824 = vmatprep.subr.bf16.mxu1 %v3161_v40  ;;  %v67_v24 = vld [vmem:[#allocation2] sm:$0xff]  ;;  %v70_v29 = vld [vmem:[#allocation2 + $0x18] sm:$0xff]  ;;  %v73_v32 = vld [vmem:[#allocation2 + $0x30] sm:$0xff] }
  0x3d   :  { %v71_v26 = vld [vmem:[#allocation2 + $0x20] sm:$0xff]  ;;  %v74_v31 = vld [vmem:[#allocation2 + $0x38] sm:$0xff]  ;;  %v77_v35 = vld [vmem:[#allocation2 + $0x50] sm:$0xff] }
  0x3e   :  { %2709 = vmatpush1.bf16.msra.mxu0 %v2708_v30  ;;  %v132_v30 = vld [vmem:[#allocation2 + $0x208] sm:$0xff]  ;;  %v138_v34 = vld [vmem:[#allocation2 + $0x238] sm:$0xff]  ;;  %v147_v39 = vld [vmem:[#allocation2 + $0x280] sm:$0xff] }
  0x3f   :  { %2710 = vmatprep.subr.bf16.mxu0 %v3050_v0  ;;  %2832 = vmatpush3.bf16.msra.mxu1 %v3161_v40  ;;  %v76_v36 = vld [vmem:[#allocation2 + $0x48] sm:$0xff]  ;;  %v150_v41 = vld [vmem:[#allocation2 + $0x298] sm:$0xff]  ;;  %v83_v42 = vld [vmem:[#allocation2 + $0x80] sm:$0xff] }
  0x40   :  { %2825 = vmatprep.subr.bf16.mxu1 %v3166_v46  ;;  %v80_v38 = vld [vmem:[#allocation2 + $0x68] sm:$0xff]  ;;  %v86_v45 = vld [vmem:[#allocation2 + $0x98] sm:$0xff]  ;;  %v159_v47 = vld [vmem:[#allocation2 + $0x2e0] sm:$0xff] }
  0x41   :  { %v156_v44 = vld [vmem:[#allocation2 + $0x2c8] sm:$0xff]  ;;  %v162_v48 = vld [vmem:[#allocation2 + $0x2f8] sm:$0xff]  ;;  %v91_v51 = vld [vmem:[#allocation2 + $0xc0] sm:$0xff] }
  0x42   :  { %2712 = vmatpush1.bf16.msra.mxu0 %v2711_v37  ;;  %v144_v37 = vld [vmem:[#allocation2 + $0x268] sm:$0xff]  ;;  %v94_v53 = vld [vmem:[#allocation2 + $0xd8] sm:$0xff]  ;;  %v101_v56 = vld [vmem:[#allocation2 + $0x110] sm:$0xff] }
  0x43   :  { %2713 = vmatprep.subr.bf16.mxu0 %v3050_v0  ;;  %2833 = vmatpush3.bf16.msra.mxu1 %v3166_v46  ;;  %v92_v50 = vld [vmem:[#allocation2 + $0xc8] sm:$0xff]  ;;  %v98_v54 = vld [vmem:[#allocation2 + $0xf8] sm:$0xff]  ;;  %v107_v60 = vld [vmem:[#allocation2 + $0x140] sm:$0xff] }
  0x44   :  { %2826 = vmatprep.subr.bf16.mxu1 %v3171_v52  ;;  %v104_v57 = vld [vmem:[#allocation2 + $0x128] sm:$0xff]  ;;  %v110_v61 = vld [vmem:[#allocation2 + $0x158] sm:$0xff]  ;;  %v121_v7 = vld [vmem:[#allocation2 + $0x1b0] sm:$0xff] }
  0x45   :  { %v112_v1 = vld [vmem:[#allocation2 + $0x168] sm:$0xff]  ;;  %v122_v6 = vld [vmem:[#allocation2 + $0x1b8] sm:$0xff]  ;;  %v127_v11 = vld [vmem:[#allocation2 + $0x1e0] sm:$0xff] }
  0x46   :  { %2715 = vmatpush1.bf16.msra.mxu0 %v2714_v43  ;;  %v153_v43 = vld [vmem:[#allocation2 + $0x2b0] sm:$0xff]  ;;  %v116_v2 = vld [vmem:[#allocation2 + $0x188] sm:$0xff]  ;;  %v131_v12 = vld [vmem:[#allocation2 + $0x200] sm:$0xff] }
  0x47   :  { %2716 = vmatprep.subr.bf16.mxu0 %v3050_v0  ;;  %2834 = vmatpush3.bf16.msra.mxu1 %v3171_v52  ;;  %v137_v16 = vld [vmem:[#allocation2 + $0x230] sm:$0xff]  ;;  %v136_v17 = vld [vmem:[#allocation2 + $0x228] sm:$0xff] }
  0x48   :  { %2827 = vmatprep.subr.bf16.mxu1 %v3176_v58 }
  0x4a   :  { %2718 = vmatpush1.bf16.msra.mxu0 %v2717_v49  ;;  %v89_v49 = vld [vmem:[#allocation2 + $0xb0] sm:$0xff] }
  0x4b   :  { %2719 = vmatprep.subr.bf16.mxu0 %v3050_v0  ;;  %2835 = vmatpush3.bf16.msra.mxu1 %v3176_v58 }
  0x4e   :  { %2721 = vmatpush1.bf16.msra.mxu0 %v2720_v55  ;;  %2513 = vmatmul.mubr.f32.vlgmr.msra.gmra.mrb[0].mxu1 %v96_v63  ;;  %v97_v55 = vld [vmem:[#allocation2 + $0xf0] sm:$0xff] }
  0x4f   :  { %2722 = vmatprep.subr.bf16.mxu0 %v3050_v0  ;;  %2515 = vmatprep.mubr.f32.mxu1 %v99_v3  ;;  %v113_v63 = vld [vmem:[#allocation2 + $0x170] sm:$0xff]  ;;  %v115_v3 = vld [vmem:[#allocation2 + $0x180] sm:$0xff] }
  0x52   :  { %2724 = vmatpush1.bf16.msra.mxu0 %v2723_v59  ;;  %2516 = vmatmul.mubr.f32.gmra.mrb[2].mxu1 %v102_v5  ;;  %v103_v59 = vld [vmem:[#allocation2 + $0x120] sm:$0xff]  ;;  %v118_v5 = vld [vmem:[#allocation2 + $0x198] sm:$0xff] }
  0x53   :  { %2725 = vmatprep.subr.bf16.mxu0 %v3050_v0  ;;  %2518 = vmatprep.mubr.f32.mxu1 %v105_v8  ;;  %v125_v8 = vld [vmem:[#allocation2 + $0x1d0] sm:$0xff] }
  0x56   :  { %2727 = vmatpush1.bf16.msra.mxu0 %v2726_v62  ;;  %2519 = vmatmul.mubr.f32.gmra.mrb[4].mxu1 %v108_v10  ;;  %v109_v62 = vld [vmem:[#allocation2 + $0x150] sm:$0xff]  ;;  %v128_v10 = vld [vmem:[#allocation2 + $0x1e8] sm:$0xff] }
  0x57   :  { %2728 = vmatprep.subr.bf16.mxu0 %v3050_v0  ;;  %2521 = vmatprep.mubr.f32.mxu1 %v111_v13  ;;  %v130_v13 = vld [vmem:[#allocation2 + $0x1f8] sm:$0xff] }
  0x5a   :  { %2730 = vmatpush1.bf16.msra.mxu0 %v2729_v4  ;;  %2522 = vmatmul.mubr.f32.gmra.mrb[6].mxu1 %v114_v15  ;;  %v119_v4 = vld [vmem:[#allocation2 + $0x1a0] sm:$0xff]  ;;  %v133_v15 = vld [vmem:[#allocation2 + $0x210] sm:$0xff] }
  0x5b   :  { %2731 = vmatprep.subr.bf16.mxu0 %v3050_v0  ;;  %2524 = vmatprep.mubr.f32.mxu1 %v117_v19  ;;  %v140_v19 = vld [vmem:[#allocation2 + $0x248] sm:$0xff] }
  0x5e   :  { %2733 = vmatpush1.bf16.msra.mxu0 %v2732_v9  ;;  %2525 = vmatmul.mubr.f32.gmra.mrb[8].mxu1 %v120_v22  ;;  %v124_v9 = vld [vmem:[#allocation2 + $0x1c8] sm:$0xff]  ;;  %v143_v22 = vld [vmem:[#allocation2 + $0x260] sm:$0xff] }
  0x5f   :  { %2734 = vmatprep.subr.bf16.mxu0 %v3050_v0  ;;  %2527 = vmatprep.mubr.f32.mxu1 %v123_v23  ;;  %v142_v23 = vld [vmem:[#allocation2 + $0x258] sm:$0xff] }
  0x62   :  { %2736 = vmatpush1.bf16.msra.mxu0 %v2735_v14  ;;  %2528 = vmatmul.mubr.f32.gmra.mrb[10].mxu1 %v126_v25  ;;  %v134_v14 = vld [vmem:[#allocation2 + $0x218] sm:$0xff]  ;;  %v145_v25 = vld [vmem:[#allocation2 + $0x270] sm:$0xff] }
  0x63   :  { %2737 = vmatprep.subr.bf16.mxu0 %v3050_v0  ;;  %2530 = vmatprep.mubr.f32.mxu1 %v129_v28  ;;  %v135_v0 = vld [vmem:[#allocation2 + $0x220] sm:$0xff]  ;;  %v148_v28 = vld [vmem:[#allocation2 + $0x288] sm:$0xff] }
  0x66   :  { %2739 = vmatpush1.bf16.msra.mxu0 %v2738_v20  ;;  %2531 = vmatmul.mubr.f32.gmra.mrb[12].mxu1 %v132_v30  ;;  %v139_v20 = vld [vmem:[#allocation2 + $0x240] sm:$0xff] }
  0x67   :  { %2741 = vmatprep.subr.bf16.mxu0 %v3143_v18  ;;  %2533 = vmatprep.mubr.f32.mxu1 %v135_v0  ;;  %v151_v30 = vld [vmem:[#allocation2 + $0x2a0] sm:$0xff]  ;;  %v154_v0 = vld [vmem:[#allocation2 + $0x2b8] sm:$0xff] }
  0x69   :  { %283 = vmatmul.mubr.f32.vlgmr.msra.gmra.mrb[0].mxu0 %v67_v24  ;;  %v146_v24 = vld [vmem:[#allocation2 + $0x278] sm:$0xff] }
  0x6a   :  { %2743 = vmatpush3.bf16.msra.mxu0 %v3143_v18  ;;  %287 = vmatprep.mubr.f32.mxu0 %v71_v26  ;;  %v141_v18 = vld [vmem:[#allocation2 + $0x250] sm:$0xff] }
  0x6b   :  { %2745 = vmatprep.subr.bf16.mxu0 %v3146_v21  ;;  %2534 = vmatmul.mubr.f32.gmra.mrb[14].mxu1 %v138_v34  ;;  %v149_v26 = vld [vmem:[#allocation2 + $0x290] sm:$0xff] }
  0x6c   :  { %2536 = vmatprep.mubr.f32.mxu1 %v141_v18  ;;  %v157_v34 = vld [vmem:[#allocation2 + $0x2d0] sm:$0xff]  ;;  %v160_v18 = vld [vmem:[#allocation2 + $0x2e8] sm:$0xff] }
  0x6d   :  { %288 = vmatmul.mubr.f32.gmra.mrb[2].mxu0 %v70_v29  ;;  %v152_v29 = vld [vmem:[#allocation2 + $0x2a8] sm:$0xff] }
  0x6e   :  { %292 = vmatprep.mubr.f32.mxu0 %v74_v31  ;;  %2747 = vmatpush3.bf16.msra.mxu0 %v3146_v21  ;;  %v79_v21 = vld [vmem:[#allocation2 + $0x60] sm:$0xff] }
  0x6f   :  { %2749 = vmatprep.subr.bf16.mxu0 %v3151_v27  ;;  %2537 = vmatmul.mubr.f32.gmra.mrb[16].mxu1 %v144_v37  ;;  %v155_v31 = vld [vmem:[#allocation2 + $0x2c0] sm:$0xff]  ;;  %v72_v37 = vld [vmem:[#allocation2 + $0x28] sm:$0xff] }
  0x70   :  { %2539 = vmatprep.mubr.f32.mxu1 %v147_v39  ;;  %v78_v39 = vld [vmem:[#allocation2 + $0x58] sm:$0xff] }
  0x71   :  { %293 = vmatmul.mubr.f32.gmra.mrb[4].mxu0 %v73_v32  ;;  %v158_v32 = vld [vmem:[#allocation2 + $0x2d8] sm:$0xff] }
  0x72   :  { %297 = vmatprep.mubr.f32.mxu0 %v77_v35  ;;  %2751 = vmatpush3.bf16.msra.mxu0 %v3151_v27  ;;  %v82_v27 = vld [vmem:[#allocation2 + $0x78] sm:$0xff]  ;;  %v161_v35 = vld [vmem:[#allocation2 + $0x2f0] sm:$0xff] }
  0x73   :  { %2753 = vmatprep.subr.bf16.mxu0 %v3156_v33  ;;  %2540 = vmatmul.mubr.f32.gmra.mrb[18].mxu1 %v150_v41  ;;  %v84_v41 = vld [vmem:[#allocation2 + $0x88] sm:$0xff] }
  0x74   :  { %2542 = vmatprep.mubr.f32.mxu1 %v153_v43  ;;  %v90_v43 = vld [vmem:[#allocation2 + $0xb8] sm:$0xff] }
  0x75   :  { %298 = vmatmul.mubr.f32.gmra.mrb[6].mxu0 %v76_v36  ;;  %v69_v36 = vld [vmem:[#allocation2 + $0x10] sm:$0xff] }
  0x76   :  { %302 = vmatprep.mubr.f32.mxu0 %v80_v38  ;;  %2755 = vmatpush3.bf16.msra.mxu0 %v3156_v33  ;;  %v85_v33 = vld [vmem:[#allocation2 + $0x90] sm:$0xff]  ;;  %v75_v38 = vld [vmem:[#allocation2 + $0x40] sm:$0xff] }
  0x77   :  { %2757 = vmatprep.subr.bf16.mxu0 %v3161_v40  ;;  %2543 = vmatmul.mubr.f32.gmra.mrb[20].mxu1 %v156_v44 }
  0x78   :  { %2545 = vmatprep.mubr.f32.mxu1 %v159_v47 }
  0x79   :  { %303 = vmatmul.mubr.f32.gmra.mrb[8].mxu0 %v79_v21  ;;  %v81_v21 = vld [vmem:[#allocation2 + $0x70] sm:$0xff] }
  0x7a   :  { %307 = vmatprep.mubr.f32.mxu0 %v83_v42  ;;  %2759 = vmatpush3.bf16.msra.mxu0 %v3161_v40  ;;  %v88_v40 = vld [vmem:[#allocation2 + $0xa8] sm:$0xff]  ;;  %v87_v42 = vld [vmem:[#allocation2 + $0xa0] sm:$0xff] }
  0x7b   :  { %2761 = vmatprep.subr.bf16.mxu0 %v3166_v46  ;;  %2546 = vmatmul.mubr.f32.gmra.mrb[22].mxu1 %v162_v48 }
  0x7d   :  { %308 = vmatmul.mubr.f32.gmra.mrb[10].mxu0 %v82_v27 }
  0x7e   :  { %312 = vmatprep.mubr.f32.mxu0 %v86_v45  ;;  %2763 = vmatpush3.bf16.msra.mxu0 %v3166_v46  ;;  %v95_v46 = vld [vmem:[#allocation2 + $0xe0] sm:$0xff] }
  0x7f   :  { %2765 = vmatprep.subr.bf16.mxu0 %v3171_v52 }
  0x81   :  { %313 = vmatmul.mubr.f32.gmra.mrb[12].mxu0 %v85_v33 }
  0x82   :  { %317 = vmatprep.mubr.f32.mxu0 %v89_v49  ;;  %2767 = vmatpush3.bf16.msra.mxu0 %v3171_v52  ;;  %v100_v52 = vld [vmem:[#allocation2 + $0x108] sm:$0xff] }
  0x83   :  { %2769 = vmatprep.subr.bf16.mxu0 %v3176_v58 }
  0x85   :  { %318 = vmatmul.mubr.f32.gmra.mrb[14].mxu0 %v88_v40 }
  0x86   :  { %322 = vmatprep.mubr.f32.mxu0 %v92_v50  ;;  %2771 = vmatpush3.bf16.msra.mxu0 %v3176_v58  ;;  %v106_v58 = vld [vmem:[#allocation2 + $0x138] sm:$0xff] }
  0x89   :  { %323 = vmatmul.mubr.f32.gmra.mrb[16].mxu0 %v91_v51 }
  0x8a   :  { %327 = vmatprep.mubr.f32.mxu0 %v95_v46 }
  0x8d   :  { %328 = vmatmul.mubr.f32.gmra.mrb[18].mxu0 %v94_v53 }
  0x8e   :  { %332 = vmatprep.mubr.f32.mxu0 %v98_v54 }
  0x91   :  { %333 = vmatmul.mubr.f32.gmra.mrb[20].mxu0 %v97_v55 }
  0x92   :  { %337 = vmatprep.mubr.f32.mxu0 %v101_v56 }
  0x95   :  { %338 = vmatmul.mubr.f32.gmra.mrb[22].mxu0 %v100_v52 }
  0x96   :  { %342 = vmatprep.mubr.f32.mxu0 %v104_v57 }
  0x99   :  { %343 = vmatmul.mubr.f32.gmra.mrb[24].mxu0 %v103_v59 }
  0x9a   :  { %347 = vmatprep.mubr.f32.mxu0 %v107_v60 }
  0x9d   :  { %348 = vmatmul.mubr.f32.gmra.mrb[26].mxu0 %v106_v58 }
  0x9e   :  { %352 = vmatprep.mubr.f32.mxu0 %v110_v61 }
  0xa1   :  { %353 = vmatmul.mubr.f32.gmra.mrb[28].mxu0 %v109_v62 }
  0xa2   :  { %357 = vmatprep.mubr.f32.mxu0 %v113_v63 }
  0xa5   :  { %358 = vmatmul.mubr.f32.gmra.mrb[30].mxu0 %v112_v1 }
  0xa6   :  { %362 = vmatprep.mubr.f32.mxu0 %v116_v2 }
  0xa9   :  { %363 = vmatmul.mubr.f32.gmra.mrb[32].mxu0 %v115_v3 }
  0xaa   :  { %367 = vmatprep.mubr.f32.mxu0 %v119_v4 }
  0xad   :  { %368 = vmatmul.mubr.f32.gmra.mrb[34].mxu0 %v118_v5 }
  0xae   :  { %372 = vmatprep.mubr.f32.mxu0 %v122_v6 }
  0xb1   :  { %373 = vmatmul.mubr.f32.gmra.mrb[36].mxu0 %v121_v7 }
  0xb2   :  { %377 = vmatprep.mubr.f32.mxu0 %v125_v8 }
  0xb5   :  { %378 = vmatmul.mubr.f32.gmra.mrb[38].mxu0 %v124_v9 }
  0xb6   :  { %382 = vmatprep.mubr.f32.mxu0 %v128_v10 }
  0xb9   :  { %383 = vmatmul.mubr.f32.gmra.mrb[40].mxu0 %v127_v11 }
  0xba   :  { %387 = vmatprep.mubr.f32.mxu0 %v131_v12 }
  0xbd   :  { %388 = vmatmul.mubr.f32.gmra.mrb[42].mxu0 %v130_v13 }
  0xbe   :  { %392 = vmatprep.mubr.f32.mxu0 %v134_v14 }
  0xc1   :  { %393 = vmatmul.mubr.f32.gmra.mrb[44].mxu0 %v133_v15 }
  0xc2   :  { %397 = vmatprep.mubr.f32.mxu0 %v137_v16 }
  0xc5   :  { %398 = vmatmul.mubr.f32.gmra.mrb[46].mxu0 %v136_v17 }
  0xc6   :  { %402 = vmatprep.mubr.f32.mxu0 %v140_v19  ;;  %v3256_v19 = vld [vmem:[%s4298_s2] ss:$0 sm:$0xff] }
  0xc9   :  { %403 = vmatmul.mubr.f32.gmra.mrb[48].mxu0 %v139_v20 }
  0xca   :  { %407 = vmatprep.mubr.f32.mxu0 %v143_v22 }
  0xcd   :  { %408 = vmatmul.mubr.f32.gmra.mrb[50].mxu0 %v142_v23 }
  0xce   :  { %412 = vmatprep.mubr.f32.mxu0 %v146_v24 }
  0xd1   :  { %413 = vmatmul.mubr.f32.gmra.mrb[52].mxu0 %v145_v25 }
  0xd2   :  { %417 = vmatprep.mubr.f32.mxu0 %v149_v26 }
  0xd5   :  { %418 = vmatmul.mubr.f32.gmra.mrb[54].mxu0 %v148_v28 }
  0xd6   :  { %422 = vmatprep.mubr.f32.mxu0 %v152_v29 }
  0xd9   :  { %423 = vmatmul.mubr.f32.gmra.mrb[56].mxu0 %v151_v30 }
  0xda   :  { %427 = vmatprep.mubr.f32.mxu0 %v155_v31 }
  0xdd   :  { %428 = vmatmul.mubr.f32.gmra.mrb[58].mxu0 %v154_v0 }
  0xde   :  { %432 = vmatprep.mubr.f32.mxu0 %v158_v32 }
  0xe1   :  { %433 = vmatmul.mubr.f32.gmra.mrb[60].mxu0 %v157_v34 }
  0xe2   :  { %437 = vmatprep.mubr.f32.mxu0 %v161_v35 }
  0xe5   :  { %438 = vmatmul.mubr.f32.gmra.mrb[62].mxu0 %v160_v18 }
  0xe6   :  { %2500 = vmatprep.mubr.f32.mxu0 %v69_v36 }
  0xe9   :  { %2501 = vmatmul.mubr.f32.vlgmr.msra.gmra.mrb[64].mxu0 %v72_v37 }
  0xea   :  { %2503 = vmatprep.mubr.f32.mxu0 %v75_v38 }
  0xed   :  { %2504 = vmatmul.mubr.f32.gmra.mrb[66].mxu0 %v78_v39 }
  0xee   :  { %2506 = vmatprep.mubr.f32.mxu0 %v81_v21 }
  0xf1   :  { %2507 = vmatmul.mubr.f32.gmra.mrb[68].mxu0 %v84_v41 }
  0xf2   :  { %2509 = vmatprep.mubr.f32.mxu0 %v87_v42 }
  0xf5   :  { %2510 = vmatmul.mubr.f32.gmra.mrb[70].mxu0 %v90_v43 }
 0x121   :  { %v2514_v27 = vpop.f32.mrb[0].mxu1 }
 0x122   :  { %v549_v44 = vpop.f32.mrb[1].mxu1 }
 0x125   :  { %v2517_v45 = vpop.f32.mrb[2].mxu1 }
 0x126   :  { %v559_v47 = vpop.f32.mrb[3].mxu1 }
 0x129   :  { %v2520_v33 = vpop.f32.mrb[4].mxu1 }
 0x12a   :  { %v569_v48 = vpop.f32.mrb[5].mxu1 }
 0x12d   :  { %v3203_v49 = vpop.f32.mrb[6].mxu1 }
 0x12e   :  { %v579_v40 = vpop.f32.mrb[7].mxu1 }
 0x131   :  { %v3205_v50 = vpop.f32.mrb[8].mxu1 }
 0x132   :  { %v3207_v51 = vpop.f32.mrb[9].mxu1 }
 0x135   :  { %v3211_v53 = vpop.f32.mrb[10].mxu1 }
 0x136   :  { %v3213_v55 = vpop.f32.mrb[11].mxu1 }
 0x139   :  { %v3217_v52 = vpop.f32.mrb[12].mxu1 }
 0x13a   :  { %v3219_v59 = vpop.f32.mrb[13].mxu1 }
 0x13c   :  { %v3209_v46 = vpop.f32.mrb[0].mxu0 }
 0x13d   :  { %v286_v54 = vpop.f32.mrb[1].mxu0 }
 0x13e   :  { %v3223_v58 = vpop.f32.mrb[14].mxu1 }
 0x13f   :  { %v3225_v62 = vpop.f32.mrb[15].mxu1 }
 0x140   :  { %v3215_v56 = vpop.f32.mrb[2].mxu0 }
 0x141   :  { %v291_v57 = vpop.f32.mrb[3].mxu0 }
 0x142   :  { %v3229_v1 = vpop.f32.mrb[16].mxu1 }
 0x143   :  { %v3231_v3 = vpop.f32.mrb[17].mxu1 }
 0x144   :  { %v3221_v60 = vpop.f32.mrb[4].mxu0 }
 0x145   :  { %v296_v61 = vpop.f32.mrb[5].mxu0 }
 0x146   :  { %v3235_v5 = vpop.f32.mrb[18].mxu1 }
 0x147   :  { %v3237_v7 = vpop.f32.mrb[19].mxu1 }
 0x148   :  { %v3227_v63 = vpop.f32.mrb[6].mxu0 }
 0x149   :  { %v301_v2 = vpop.f32.mrb[7].mxu0 }
 0x14a   :  { %v3241_v9 = vpop.f32.mrb[20].mxu1 }
 0x14b   :  { %v3243_v11 = vpop.f32.mrb[21].mxu1 }
 0x14c   :  { %v3233_v4 = vpop.f32.mrb[8].mxu0 }
 0x14d   :  { %v306_v6 = vpop.f32.mrb[9].mxu0 }
 0x14e   :  { %v3247_v13 = vpop.f32.mrb[22].mxu1 }
 0x14f   :  { %v3249_v15 = vpop.f32.mrb[23].mxu1 }
 0x150   :  { %v3239_v8 = vpop.f32.mrb[10].mxu0 }
 0x151   :  { %v311_v10 = vpop.f32.mrb[11].mxu0 }
 0x154   :  { %v3245_v12 = vpop.f32.mrb[12].mxu0 }
 0x155   :  { %v316_v14 = vpop.f32.mrb[13].mxu0 }
 0x158   :  { %v3251_v16 = vpop.f32.mrb[14].mxu0 }
 0x159   :  { %v321_v17 = vpop.f32.mrb[15].mxu0 }
 0x15c   :  { %v324_v20 = vpop.f32.mrb[16].mxu0 }
 0x15d   :  { %v325_v22 = vadd.f32 %v3256_v19, %v324_v20  ;;  %v326_v23 = vpop.f32.mrb[17].mxu0 }
 0x15f   :  { %v3259_v24 = vadd.f32 %v549_v44, %v325_v22 }
 0x160   :  { %v329_v25 = vpop.f32.mrb[18].mxu0 }
 0x161   :  { %v330_v26 = vadd.f32 %v3256_v19, %v329_v25  ;;  %v331_v28 = vpop.f32.mrb[19].mxu0 }
 0x163   :  { %v3262_v29 = vadd.f32 %v2514_v27, %v330_v26 }
 0x164   :  { %v334_v30 = vpop.f32.mrb[20].mxu0 }
 0x165   :  { %v335_v31 = vadd.f32 %v3256_v19, %v334_v30  ;;  %v336_v0 = vpop.f32.mrb[21].mxu0 }
 0x167   :  { %v3265_v32 = vadd.f32 %v559_v47, %v335_v31 }
 0x168   :  { %v339_v34 = vpop.f32.mrb[22].mxu0 }
 0x169   :  { %v340_v35 = vadd.f32 %v3256_v19, %v339_v34  ;;  %v341_v18 = vpop.f32.mrb[23].mxu0 }
 0x16b   :  { %v3268_v36 = vadd.f32 %v2517_v45, %v340_v35 }
 0x16c   :  { %v344_v37 = vpop.f32.mrb[24].mxu0 }
 0x16d   :  { %v345_v38 = vadd.f32 %v3256_v19, %v344_v37  ;;  %v346_v39 = vpop.f32.mrb[25].mxu0 }
 0x16f   :  { %v3271_v21 = vadd.f32 %v569_v48, %v345_v38 }
 0x170   :  { %v349_v41 = vpop.f32.mrb[26].mxu0 }
 0x171   :  { %v350_v42 = vadd.f32 %v3256_v19, %v349_v41  ;;  %v351_v43 = vpop.f32.mrb[27].mxu0 }
 0x173   :  { %v3274_v27 = vadd.f32 %v2520_v33, %v350_v42 }
 0x174   :  { %v354_v44 = vpop.f32.mrb[28].mxu0 }
 0x175   :  { %v355_v47 = vadd.f32 %v3256_v19, %v354_v44  ;;  %v356_v54 = vpop.f32.mrb[29].mxu0 }
 0x177   :  { %v3277_v57 = vadd.f32 %v579_v40, %v355_v47 }
 0x178   :  { %v359_v45 = vpop.f32.mrb[30].mxu0 }
 0x179   :  { %v360_v61 = vadd.f32 %v3256_v19, %v359_v45  ;;  %v361_v2 = vpop.f32.mrb[31].mxu0 }
 0x17b   :  { %v3281_v6 = vadd.f32 %v3203_v49, %v360_v61 }
 0x17c   :  { %v364_v48 = vpop.f32.mrb[32].mxu0 }
 0x17d   :  { %v365_v10 = vadd.f32 %v3256_v19, %v364_v48  ;;  %v366_v14 = vpop.f32.mrb[33].mxu0 }
 0x17f   :  { %v3285_v33 = vadd.f32 %v3207_v51, %v365_v10 }
 0x180   :  { %v369_v17 = vpop.f32.mrb[34].mxu0 }
 0x181   :  { %v370_v20 = vadd.f32 %v3256_v19, %v369_v17  ;;  %v371_v22 = vpop.f32.mrb[35].mxu0 }
 0x183   :  { %v3289_v40 = vadd.f32 %v3205_v50, %v370_v20 }
 0x184   :  { %v374_v23 = vpop.f32.mrb[36].mxu0 }
 0x185   :  { %v375_v25 = vadd.f32 %v3256_v19, %v374_v23  ;;  %v376_v26 = vpop.f32.mrb[37].mxu0 }
 0x187   :  { %v3293_v49 = vadd.f32 %v3213_v55, %v375_v25 }
 0x188   :  { %v379_v28 = vpop.f32.mrb[38].mxu0 }
 0x189   :  { %v380_v30 = vadd.f32 %v3256_v19, %v379_v28  ;;  %v381_v31 = vpop.f32.mrb[39].mxu0 }
 0x18b   :  { %v3297_v51 = vadd.f32 %v3211_v53, %v380_v30 }
 0x18c   :  { %v384_v0 = vpop.f32.mrb[40].mxu0 }
 0x18d   :  { %v385_v34 = vadd.f32 %v3256_v19, %v384_v0  ;;  %v386_v35 = vpop.f32.mrb[41].mxu0 }
 0x18f   :  { %v3301_v50 = vadd.f32 %v3219_v59, %v385_v34 }
 0x190   :  { %v389_v18 = vpop.f32.mrb[42].mxu0 }
 0x191   :  { %v390_v37 = vadd.f32 %v3256_v19, %v389_v18  ;;  %v391_v38 = vpop.f32.mrb[43].mxu0 }
 0x193   :  { %v3305_v55 = vadd.f32 %v3217_v52, %v390_v37 }
 0x194   :  { %v394_v39 = vpop.f32.mrb[44].mxu0 }
 0x195   :  { %v395_v41 = vadd.f32 %v3256_v19, %v394_v39  ;;  %v396_v42 = vpop.f32.mrb[45].mxu0 }
 0x197   :  { %v3309_v53 = vadd.f32 %v3225_v62, %v395_v41 }
 0x198   :  { %v399_v43 = vpop.f32.mrb[46].mxu0 }
 0x199   :  { %v400_v44 = vadd.f32 %v3256_v19, %v399_v43  ;;  %v401_v47 = vpop.f32.mrb[47].mxu0 }
 0x19b   :  { %v3313_v59 = vadd.f32 %v3223_v58, %v400_v44 }
 0x19c   :  { %v404_v54 = vpop.f32.mrb[48].mxu0 }
 0x19d   :  { %v405_v45 = vadd.f32 %v3256_v19, %v404_v54  ;;  %v406_v61 = vpop.f32.mrb[49].mxu0 }
 0x19f   :  { %v3317_v52 = vadd.f32 %v3231_v3, %v405_v45  ;;  %v295_v45 = vadd.f32 %v3256_v19, %v3221_v60 }
 0x1a0   :  { %v409_v2 = vpop.f32.mrb[50].mxu0 }
 0x1a1   :  { %v410_v48 = vadd.f32 %v3256_v19, %v409_v2  ;;  %v411_v10 = vpop.f32.mrb[51].mxu0 }
 0x1a3   :  { %v3321_v62 = vadd.f32 %v3229_v1, %v410_v48  ;;  %v305_v48 = vadd.f32 %v3256_v19, %v3233_v4 }
 0x1a4   :  { %v414_v14 = vpop.f32.mrb[52].mxu0 }
 0x1a5   :  { %v415_v17 = vadd.f32 %v3256_v19, %v414_v14  ;;  %v416_v20 = vpop.f32.mrb[53].mxu0 }
 0x1a6   :  { %v315_v20 = vadd.f32 %v3256_v19, %v3245_v12  ;;  %v1131_v12 = vld [vmem:[%s4301_s5] sm:$0xff] }
 0x1a7   :  { %v3325_v58 = vadd.f32 %v3237_v7, %v415_v17  ;;  %v320_v17 = vadd.f32 %v3256_v19, %v3251_v16  ;;  %v1132_v16 = vld [vmem:[%s4301_s5 + $0x8] sm:$0xff] }
 0x1a8   :  { %v419_v22 = vpop.f32.mrb[54].mxu0 }
 0x1a9   :  { %v420_v23 = vadd.f32 %v3256_v19, %v419_v22  ;;  %v421_v25 = vpop.f32.mrb[55].mxu0 }
 0x1aa   :  { %v2772_v25 = vpack.c.bf16 %v1132_v16, %v1131_v12 }
 0x1ab   :  { %v3329_v3 = vadd.f32 %v3235_v5, %v420_v23 }
 0x1ac   :  { %v424_v26 = vpop.f32.mrb[56].mxu0  ;;  %2773 = vmatprep.subr.bf16.mxu1 %v2772_v25 }
 0x1ad   :  { %v425_v28 = vadd.f32 %v3256_v19, %v424_v26  ;;  %v426_v30 = vpop.f32.mrb[57].mxu0  ;;  %v1134_v26 = vld [vmem:[%s4301_s5 + $0x18] sm:$0xff]  ;;  %2775 = vmatpush3.bf16.msra.mxu1 %v2772_v25 }
 0x1ae   :  { %v1135_v30 = vld [vmem:[%s4301_s5 + $0x20] sm:$0xff] }
 0x1af   :  { %v3333_v1 = vadd.f32 %v3243_v11, %v425_v28  ;;  %v290_v11 = vadd.f32 %v3256_v19, %v3215_v56 }
 0x1b0   :  { %v429_v31 = vpop.f32.mrb[58].mxu0 }
 0x1b1   :  { %v430_v0 = vadd.f32 %v3256_v19, %v429_v31  ;;  %v431_v34 = vpop.f32.mrb[59].mxu0  ;;  %v1136_v31 = vld [vmem:[%s4301_s5 + $0x28] sm:$0xff] }
 0x1b2   :  { %v1137_v34 = vld [vmem:[%s4301_s5 + $0x30] sm:$0xff] }
 0x1b3   :  { %v3337_v7 = vadd.f32 %v3241_v9, %v430_v0  ;;  %v285_v9 = vadd.f32 %v3256_v19, %v3209_v46  ;;  %v310_v46 = vadd.f32 %v3256_v19, %v3239_v8  ;;  %v2780_v0 = vpack.c.bf16 %v1136_v31, %v1135_v30 }
 0x1b4   :  { %v434_v35 = vpop.f32.mrb[60].mxu0 }
 0x1b5   :  { %v435_v18 = vadd.f32 %v3256_v19, %v434_v35  ;;  %v436_v37 = vpop.f32.mrb[61].mxu0  ;;  %v1138_v35 = vld [vmem:[%s4301_s5 + $0x38] sm:$0xff] }
 0x1b7   :  { %v3341_v5 = vadd.f32 %v3249_v15, %v435_v18  ;;  %v300_v15 = vadd.f32 %v3256_v19, %v3227_v63  ;;  %v2784_v18 = vpack.c.bf16 %v1138_v35, %v1137_v34 }
 0x1b8   :  { %v439_v38 = vpop.f32.mrb[62].mxu0 }
 0x1b9   :  { %v440_v39 = vadd.f32 %v3256_v19, %v439_v38  ;;  %v441_v41 = vpop.f32.mrb[63].mxu0  ;;  %v1133_v19 = vld [vmem:[%s4301_s5 + $0x10] sm:$0xff] }
 0x1ba   :  { %v2776_v28 = vpack.c.bf16 %v1134_v26, %v1133_v19 }
 0x1bb   :  { %v3347_v42 = vadd.f32 %v3247_v13, %v440_v39 }
 0x1bc   :  { %v2502_v43 = vpop.f32.mrb[64].mxu0  ;;  %2777 = vmatprep.subr.bf16.mxu1 %v2776_v28 }
 0x1bd   :  { %v3351_v44 = vadd.f32 %v2502_v43, %v290_v11  ;;  %v509_v47 = vpop.f32.mrb[65].mxu0  ;;  %2779 = vmatpush3.bf16.msra.mxu1 %v2776_v28 }
 0x1be   :  { %v3353_v54 = vadd.f32 %v509_v47, %v285_v9  ;;  %2781 = vmatprep.subr.bf16.mxu1 %v2780_v0 }
 0x1c0   :  { %v2505_v61 = vpop.f32.mrb[66].mxu0  ;;  %670 = vadd.xlane.f32.xlu0 %v3353_v54 }
 0x1c1   :  { %v3360_v56 = vadd.f32 %v2505_v61, %v300_v15  ;;  %v519_v13 = vpop.f32.mrb[67].mxu0  ;;  %2783 = vmatpush3.bf16.msra.mxu1 %v2780_v0 }
 0x1c2   :  { %v3362_v2 = vadd.f32 %v519_v13, %v295_v45  ;;  %2785 = vmatprep.subr.bf16.mxu1 %v2784_v18 }
 0x1c4   :  { %v2508_v10 = vpop.f32.mrb[68].mxu0  ;;  %674 = vadd.xlane.f32.xlu1 %v3362_v2  ;;  %672 = vadd.xlane.f32.xlu0 %v3351_v44 }
 0x1c5   :  { %v3370_v60 = vadd.f32 %v2508_v10, %v310_v46  ;;  %v529_v63 = vpop.f32.mrb[69].mxu0  ;;  %2787 = vmatpush3.bf16.msra.mxu1 %v2784_v18 }
 0x1c6   :  { %v3372_v14 = vadd.f32 %v529_v63, %v305_v48 }
 0x1c8   :  { %v2511_v8 = vpop.f32.mrb[70].mxu0  ;;  %676 = vadd.xlane.f32.xlu1 %v3360_v56  ;;  %678 = vadd.xlane.f32.xlu0 %v3372_v14 }
 0x1c9   :  { %v3380_v4 = vadd.f32 %v2511_v8, %v320_v17  ;;  %v539_v22 = vpop.f32.mrb[71].mxu0 }
 0x1ca   :  { %v3382_v23 = vadd.f32 %v539_v22, %v315_v20 }
 0x1cc   :  { %680 = vadd.xlane.f32.xlu1 %v3370_v60  ;;  %682 = vadd.xlane.f32.xlu0 %v3382_v23 }
 0x1d0   :  { %684 = vadd.xlane.f32.xlu1 %v3380_v4  ;;  %686 = vadd.xlane.f32.xlu0 %v3259_v24 }
 0x1d4   :  { %688 = vadd.xlane.f32.xlu1 %v3262_v29  ;;  %690 = vadd.xlane.f32.xlu0 %v3265_v32 }
 0x1d8   :  { %692 = vadd.xlane.f32.xlu1 %v3268_v36  ;;  %694 = vadd.xlane.f32.xlu0 %v3271_v21 }
 0x1dc   :  { %696 = vadd.xlane.f32.xlu1 %v3274_v27  ;;  %698 = vadd.xlane.f32.xlu0 %v3277_v57 }
 0x1e0   :  { %700 = vadd.xlane.f32.xlu1 %v3281_v6  ;;  %702 = vadd.xlane.f32.xlu0 %v3285_v33 }
 0x1e4   :  { %704 = vadd.xlane.f32.xlu1 %v3289_v40  ;;  %706 = vadd.xlane.f32.xlu0 %v3293_v49 }
 0x1e8   :  { %708 = vadd.xlane.f32.xlu1 %v3297_v51  ;;  %710 = vadd.xlane.f32.xlu0 %v3301_v50 }
 0x1ec   :  { %712 = vadd.xlane.f32.xlu1 %v3305_v55  ;;  %714 = vadd.xlane.f32.xlu0 %v3309_v53 }
 0x1f0   :  { %716 = vadd.xlane.f32.xlu1 %v3313_v59  ;;  %718 = vadd.xlane.f32.xlu0 %v3317_v52 }
 0x1f4   :  { %720 = vadd.xlane.f32.xlu1 %v3321_v62  ;;  %722 = vadd.xlane.f32.xlu0 %v3325_v58 }
 0x1f8   :  { %724 = vadd.xlane.f32.xlu1 %v3329_v3  ;;  %726 = vadd.xlane.f32.xlu0 %v3333_v1 }
 0x1fc   :  { %728 = vadd.xlane.f32.xlu1 %v3337_v7  ;;  %730 = vadd.xlane.f32.xlu0 %v3341_v5 }
 0x200   :  { %732 = vadd.xlane.f32.xlu1 %v3347_v42 }
 0x24d   :  { %v671_v37 = vpop.xlane.xlu0 %670 }
 0x24e   :  { %v735_v38 = vmul.f32 0.0078125, %v671_v37 }
 0x250   :  { %v3436_v39 = vsub.f32 %v3353_v54, %v735_v38 }
 0x251   :  { %v675_v41 = vpop.xlane.xlu1 %674  ;;  %v673_v11 = vpop.xlane.xlu0 %672 }
 0x252   :  { %v737_v9 = vmul.f32 0.0078125, %v675_v41  ;;  %v736_v43 = vmul.f32 0.0078125, %v673_v11  ;;  %v799_v47 = vmul.f32 %v3436_v39, %v3436_v39 }
 0x254   :  { %831 = vadd.xlane.f32.xlu0 %v799_v47  ;;  %v3441_v15 = vsub.f32 %v3362_v2, %v737_v9  ;;  %v3444_v45 = vsub.f32 %v3351_v44, %v736_v43 }
 0x255   :  { %v677_v61 = vpop.xlane.xlu1 %676  ;;  %v679_v13 = vpop.xlane.xlu0 %678 }
 0x256   :  { %v738_v46 = vmul.f32 0.0078125, %v677_v61  ;;  %v739_v48 = vmul.f32 0.0078125, %v679_v13  ;;  %v801_v54 = vmul.f32 %v3441_v15, %v3441_v15  ;;  %v800_v10 = vmul.f32 %v3444_v45, %v3444_v45  ;;  %v1139_v61 = vld [vmem:[%s4301_s5 + $0x40] sm:$0xff] }
 0x258   :  { %835 = vadd.xlane.f32.xlu0 %v801_v54  ;;  %833 = vadd.xlane.f32.xlu1 %v800_v10  ;;  %v3451_v63 = vsub.f32 %v3360_v56, %v738_v46  ;;  %v3454_v2 = vsub.f32 %v3372_v14, %v739_v48 }
 0x259   :  { %v681_v44 = vpop.xlane.xlu1 %680  ;;  %v683_v17 = vpop.xlane.xlu0 %682 }
 0x25a   :  { %v740_v20 = vmul.f32 0.0078125, %v681_v44  ;;  %v741_v8 = vmul.f32 0.0078125, %v683_v17  ;;  %v802_v22 = vmul.f32 %v3451_v63, %v3451_v63  ;;  %v803_v12 = vmul.f32 %v3454_v2, %v3454_v2 }
 0x25c   :  { %837 = vadd.xlane.f32.xlu1 %v802_v22  ;;  %839 = vadd.xlane.f32.xlu0 %v803_v12  ;;  %v3461_v16 = vsub.f32 %v3370_v60, %v740_v20  ;;  %v3464_v56 = vsub.f32 %v3382_v23, %v741_v8 }
 0x25d   :  { %v685_v14 = vpop.xlane.xlu1 %684  ;;  %v687_v19 = vpop.xlane.xlu0 %686 }
 0x25e   :  { %v742_v25 = vmul.f32 0.0078125, %v685_v14  ;;  %v743_v26 = vmul.f32 0.0078125, %v687_v19  ;;  %v804_v28 = vmul.f32 %v3461_v16, %v3461_v16  ;;  %v805_v30 = vmul.f32 %v3464_v56, %v3464_v56 }
 0x260   :  { %841 = vadd.xlane.f32.xlu1 %v804_v28  ;;  %843 = vadd.xlane.f32.xlu0 %v805_v30  ;;  %v3471_v31 = vsub.f32 %v3380_v4, %v742_v25  ;;  %v3474_v60 = vsub.f32 %v3259_v24, %v743_v26  ;;  %v1141_v26 = vld [vmem:[%s4301_s5 + $0x50] sm:$0xff] }
 0x261   :  { %v689_v23 = vpop.xlane.xlu1 %688  ;;  %v691_v0 = vpop.xlane.xlu0 %690 }
 0x262   :  { %v744_v34 = vmul.f32 0.0078125, %v689_v23  ;;  %v745_v35 = vmul.f32 0.0078125, %v691_v0  ;;  %v806_v18 = vmul.f32 %v3471_v31, %v3471_v31  ;;  %v807_v37 = vmul.f32 %v3474_v60, %v3474_v60 }
 0x264   :  { %845 = vadd.xlane.f32.xlu1 %v806_v18  ;;  %847 = vadd.xlane.f32.xlu0 %v807_v37  ;;  %v3481_v38 = vsub.f32 %v3262_v29, %v744_v34  ;;  %v3484_v4 = vsub.f32 %v3265_v32, %v745_v35  ;;  %v1140_v29 = vld [vmem:[%s4301_s5 + $0x48] sm:$0xff] }
 0x265   :  { %v693_v24 = vpop.xlane.xlu1 %692  ;;  %v695_v41 = vpop.xlane.xlu0 %694  ;;  %v2788_v32 = vpack.c.bf16 %v1140_v29, %v1139_v61 }
 0x266   :  { %v746_v11 = vmul.f32 0.0078125, %v693_v24  ;;  %v747_v9 = vmul.f32 0.0078125, %v695_v41  ;;  %v808_v43 = vmul.f32 %v3481_v38, %v3481_v38  ;;  %v809_v47 = vmul.f32 %v3484_v4, %v3484_v4 }
 0x267   :  { %2789 = vmatprep.subr.bf16.mxu1 %v2788_v32 }
 0x268   :  { %849 = vadd.xlane.f32.xlu1 %v808_v43  ;;  %851 = vadd.xlane.f32.xlu0 %v809_v47  ;;  %v3497_v13 = vsub.f32 %v3268_v36, %v746_v11  ;;  %v3500_v46 = vsub.f32 %v3271_v21, %v747_v9 }
 0x269   :  { %v697_v48 = vpop.xlane.xlu1 %696  ;;  %v699_v54 = vpop.xlane.xlu0 %698  ;;  %2791 = vmatpush3.bf16.msra.mxu1 %v2788_v32 }
 0x26a   :  { %v748_v10 = vmul.f32 0.0078125, %v697_v48  ;;  %v749_v44 = vmul.f32 0.0078125, %v699_v54  ;;  %v810_v17 = vmul.f32 %v3497_v13, %v3497_v13  ;;  %v811_v20 = vmul.f32 %v3500_v46, %v3500_v46 }
 0x26c   :  { %853 = vadd.xlane.f32.xlu1 %v810_v17  ;;  %855 = vadd.xlane.f32.xlu0 %v811_v20  ;;  %v3507_v36 = vsub.f32 %v3274_v27, %v748_v10  ;;  %v3510_v21 = vsub.f32 %v3277_v57, %v749_v44  ;;  %v1142_v27 = vld [vmem:[%s4301_s5 + $0x58] sm:$0xff] }
 0x26d   :  { %v701_v8 = vpop.xlane.xlu1 %700  ;;  %v703_v22 = vpop.xlane.xlu0 %702  ;;  %v2792_v30 = vpack.c.bf16 %v1142_v27, %v1141_v26 }
 0x26e   :  { %v750_v12 = vmul.f32 0.0078125, %v701_v8  ;;  %v751_v14 = vmul.f32 0.0078125, %v703_v22  ;;  %v812_v19 = vmul.f32 %v3507_v36, %v3507_v36  ;;  %v813_v25 = vmul.f32 %v3510_v21, %v3510_v21 }
 0x26f   :  { %2793 = vmatprep.subr.bf16.mxu1 %v2792_v30 }
 0x270   :  { %857 = vadd.xlane.f32.xlu1 %v812_v19  ;;  %859 = vadd.xlane.f32.xlu0 %v813_v25  ;;  %v3523_v57 = vsub.f32 %v3281_v6, %v750_v12  ;;  %v3526_v28 = vsub.f32 %v3285_v33, %v751_v14  ;;  %v1143_v6 = vld [vmem:[%s4301_s5 + $0x60] sm:$0xff]  ;;  %v1144_v33 = vld [vmem:[%s4301_s5 + $0x68] sm:$0xff] }
 0x271   :  { %v705_v23 = vpop.xlane.xlu1 %704  ;;  %v707_v0 = vpop.xlane.xlu0 %706  ;;  %2795 = vmatpush3.bf16.msra.mxu1 %v2792_v30  ;;  %v2796_v11 = vpack.c.bf16 %v1144_v33, %v1143_v6 }
 0x272   :  { %v752_v34 = vmul.f32 0.0078125, %v705_v23  ;;  %v753_v35 = vmul.f32 0.0078125, %v707_v0  ;;  %v814_v18 = vmul.f32 %v3523_v57, %v3523_v57  ;;  %v815_v37 = vmul.f32 %v3526_v28, %v3526_v28 }
 0x273   :  { %2797 = vmatprep.subr.bf16.mxu1 %v2796_v11 }
 0x274   :  { %861 = vadd.xlane.f32.xlu1 %v814_v18  ;;  %863 = vadd.xlane.f32.xlu0 %v815_v37  ;;  %v3539_v24 = vsub.f32 %v3289_v40, %v752_v34  ;;  %v3542_v41 = vsub.f32 %v3293_v49, %v753_v35  ;;  %v1145_v40 = vld [vmem:[%s4301_s5 + $0x70] sm:$0xff]  ;;  %v1146_v49 = vld [vmem:[%s4301_s5 + $0x78] sm:$0xff] }
 0x275   :  { %v709_v9 = vpop.xlane.xlu1 %708  ;;  %v711_v43 = vpop.xlane.xlu0 %710  ;;  %2799 = vmatpush3.bf16.msra.mxu1 %v2796_v11  ;;  %v2800_v10 = vpack.c.bf16 %v1146_v49, %v1145_v40 }
 0x276   :  { %v754_v47 = vmul.f32 0.0078125, %v709_v9  ;;  %v755_v61 = vmul.f32 0.0078125, %v711_v43  ;;  %v816_v29 = vmul.f32 %v3539_v24, %v3539_v24  ;;  %v817_v32 = vmul.f32 %v3542_v41, %v3542_v41 }
 0x277   :  { %2801 = vmatprep.subr.bf16.mxu1 %v2800_v10 }
 0x278   :  { %865 = vadd.xlane.f32.xlu1 %v816_v29  ;;  %867 = vadd.xlane.f32.xlu0 %v817_v32  ;;  %v3555_v48 = vsub.f32 %v3297_v51, %v754_v47  ;;  %v3558_v54 = vsub.f32 %v3301_v50, %v755_v61 }
 0x279   :  { %v713_v44 = vpop.xlane.xlu1 %712  ;;  %v715_v17 = vpop.xlane.xlu0 %714  ;;  %2803 = vmatpush3.bf16.msra.mxu1 %v2800_v10 }
 0x27a   :  { %v756_v20 = vmul.f32 0.0078125, %v713_v44  ;;  %v757_v8 = vmul.f32 0.0078125, %v715_v17  ;;  %v818_v22 = vmul.f32 %v3555_v48, %v3555_v48  ;;  %v819_v12 = vmul.f32 %v3558_v54, %v3558_v54 }
 0x27c   :  { %869 = vadd.xlane.f32.xlu1 %v818_v22  ;;  %871 = vadd.xlane.f32.xlu0 %v819_v12  ;;  %v3565_v51 = vsub.f32 %v3305_v55, %v756_v20  ;;  %v3568_v50 = vsub.f32 %v3309_v53, %v757_v8 }
 0x27d   :  { %v717_v14 = vpop.xlane.xlu1 %716  ;;  %v719_v19 = vpop.xlane.xlu0 %718 }
 0x27e   :  { %v758_v25 = vmul.f32 0.0078125, %v717_v14  ;;  %v759_v26 = vmul.f32 0.0078125, %v719_v19  ;;  %v820_v27 = vmul.f32 %v3565_v51, %v3565_v51  ;;  %v821_v30 = vmul.f32 %v3568_v50, %v3568_v50 }
 0x280   :  { %873 = vadd.xlane.f32.xlu1 %v820_v27  ;;  %875 = vadd.xlane.f32.xlu0 %v821_v30  ;;  %v3575_v23 = vsub.f32 %v3313_v59, %v758_v25  ;;  %v3578_v55 = vsub.f32 %v3317_v52, %v759_v26 }
 0x281   :  { %v721_v53 = vpop.xlane.xlu1 %720  ;;  %v723_v0 = vpop.xlane.xlu0 %722 }
 0x282   :  { %v760_v34 = vmul.f32 0.0078125, %v721_v53  ;;  %v761_v35 = vmul.f32 0.0078125, %v723_v0  ;;  %v822_v18 = vmul.f32 %v3575_v23, %v3575_v23  ;;  %v823_v37 = vmul.f32 %v3578_v55, %v3578_v55 }
 0x284   :  { %877 = vadd.xlane.f32.xlu1 %v822_v18  ;;  %879 = vadd.xlane.f32.xlu0 %v823_v37  ;;  %v3585_v6 = vsub.f32 %v3321_v62, %v760_v34  ;;  %v3588_v59 = vsub.f32 %v3325_v58, %v761_v35 }
 0x285   :  { %v725_v52 = vpop.xlane.xlu1 %724  ;;  %v727_v33 = vpop.xlane.xlu0 %726 }
 0x286   :  { %v762_v11 = vmul.f32 0.0078125, %v725_v52  ;;  %v763_v9 = vmul.f32 0.0078125, %v727_v33  ;;  %v824_v43 = vmul.f32 %v3585_v6, %v3585_v6  ;;  %v825_v47 = vmul.f32 %v3588_v59, %v3588_v59 }
 0x288   :  { %881 = vadd.xlane.f32.xlu1 %v824_v43  ;;  %883 = vadd.xlane.f32.xlu0 %v825_v47  ;;  %v3595_v61 = vsub.f32 %v3329_v3, %v762_v11  ;;  %v3598_v62 = vsub.f32 %v3333_v1, %v763_v9 }
 0x289   :  { %v729_v58 = vpop.xlane.xlu1 %728  ;;  %v731_v29 = vpop.xlane.xlu0 %730 }
 0x28a   :  { %v764_v32 = vmul.f32 0.0078125, %v729_v58  ;;  %v765_v40 = vmul.f32 0.0078125, %v731_v29  ;;  %v826_v49 = vmul.f32 %v3595_v61, %v3595_v61  ;;  %v827_v10 = vmul.f32 %v3598_v62, %v3598_v62  ;;  %v3622_v29 = vld [vmem:[%s4299_s3] ss:$0 sm:$0xff] }
 0x28c   :  { %v3605_v44 = vsub.f32 %v3341_v5, %v765_v40  ;;  %885 = vadd.xlane.f32.xlu1 %v826_v49  ;;  %887 = vadd.xlane.f32.xlu0 %v827_v10  ;;  %v3608_v3 = vsub.f32 %v3337_v7, %v764_v32 }
 0x28d   :  { %v733_v1 = vpop.xlane.xlu1 %732 }
 0x28e   :  { %v766_v17 = vmul.f32 0.0078125, %v733_v1  ;;  %v828_v20 = vmul.f32 %v3608_v3, %v3608_v3  ;;  %v829_v8 = vmul.f32 %v3605_v44, %v3605_v44 }
 0x290   :  { %v3615_v22 = vsub.f32 %v3347_v42, %v766_v17  ;;  %889 = vadd.xlane.f32.xlu1 %v828_v20  ;;  %891 = vadd.xlane.f32.xlu0 %v829_v8  ;;  %v3628_v17 = vld [vmem:[%s4300_s4] ss:$0 sm:$0xff] }
 0x292   :  { %v830_v5 = vmul.f32 %v3615_v22, %v3615_v22 }
 0x294   :  { %893 = vadd.xlane.f32.xlu1 %v830_v5 }
 0x2e1   :  { %v832_v12 = vpop.xlane.xlu0 %831 }
 0x2e2   :  { %v895_v7 = vmul.f32 0.0078125, %v832_v12 }
 0x2e4   :  { %v927_v14 = vadd.f32 1e-05, %v895_v7 }
 0x2e5   :  { %v834_v19 = vpop.xlane.xlu1 %833  ;;  %v836_v25 = vpop.xlane.xlu0 %835 }
 0x2e6   :  { %2844 = vrsqrt.f32 %v927_v14  ;;  %v896_v26 = vmul.f32 0.0078125, %v834_v19  ;;  %v897_v27 = vmul.f32 0.0078125, %v836_v25 }
 0x2e8   :  { %v928_v30 = vadd.f32 1e-05, %v896_v26  ;;  %v929_v53 = vadd.f32 1e-05, %v897_v27 }
 0x2e9   :  { %v838_v0 = vpop.xlane.xlu1 %837  ;;  %v840_v34 = vpop.xlane.xlu0 %839 }
 0x2ea   :  { %2846 = vrsqrt.f32 %v928_v30  ;;  %v898_v42 = vmul.f32 0.0078125, %v838_v0  ;;  %v899_v35 = vmul.f32 0.0078125, %v840_v34 }
 0x2eb   :  { %2848 = vrsqrt.f32 %v929_v53 }
 0x2ec   :  { %v930_v18 = vadd.f32 1e-05, %v898_v42  ;;  %v931_v37 = vadd.f32 1e-05, %v899_v35 }
 0x2ed   :  { %v842_v52 = vpop.xlane.xlu1 %841  ;;  %v844_v33 = vpop.xlane.xlu0 %843 }
 0x2ee   :  { %2850 = vrsqrt.f32 %v930_v18  ;;  %v900_v11 = vmul.f32 0.0078125, %v842_v52  ;;  %v901_v9 = vmul.f32 0.0078125, %v844_v33 }
 0x2ef   :  { %2852 = vrsqrt.f32 %v931_v37 }
 0x2f0   :  { %v2845_v43 = vpop.eup %2844  ;;  %v932_v47 = vadd.f32 1e-05, %v900_v11  ;;  %v933_v58 = vadd.f32 1e-05, %v901_v9 }
 0x2f1   :  { %v846_v32 = vpop.xlane.xlu1 %845  ;;  %v848_v40 = vpop.xlane.xlu0 %847  ;;  %v991_v49 = vmul.f32 %v2845_v43, %v3436_v39 }
 0x2f2   :  { %2854 = vrsqrt.f32 %v932_v47  ;;  %v902_v10 = vmul.f32 0.0078125, %v846_v32  ;;  %v903_v1 = vmul.f32 0.0078125, %v848_v40 }
 0x2f3   :  { %2856 = vrsqrt.f32 %v933_v58  ;;  %v1029_v20 = vmul.f32 %v3622_v29, %v991_v49 }
 0x2f4   :  { %v2847_v8 = vpop.eup %2846  ;;  %v934_v5 = vadd.f32 1e-05, %v902_v10  ;;  %v935_v12 = vadd.f32 1e-05, %v903_v1 }
 0x2f5   :  { %v2849_v7 = vpop.eup %2848  ;;  %v992_v14 = vmul.f32 %v2847_v8, %v3444_v45  ;;  %v850_v19 = vpop.xlane.xlu1 %849  ;;  %v1067_v39 = vadd.f32 %v3628_v17, %v1029_v20 }
 0x2f6   :  { %v852_v25 = vpop.xlane.xlu0 %851  ;;  %2858 = vrsqrt.f32 %v934_v5  ;;  %v904_v26 = vmul.f32 0.0078125, %v850_v19  ;;  %v993_v30 = vmul.f32 %v2849_v7, %v3441_v15 }
 0x2f7   :  { %v905_v27 = vmul.f32 0.0078125, %v852_v25  ;;  %2860 = vrsqrt.f32 %v935_v12  ;;  %v1099_v53 = vmax.f32 %v1067_v39, 0.0  ;;  %v1030_v0 = vmul.f32 %v3622_v29, %v992_v14 }
 0x2f8   :  { %v2851_v34 = vpop.eup %2850  ;;  %v936_v42 = vadd.f32 1e-05, %v904_v26  ;;  %v1031_v18 = vmul.f32 %v3622_v29, %v993_v30 }
 0x2f9   :  { %v937_v35 = vadd.f32 1e-05, %v905_v27  ;;  %v2853_v37 = vpop.eup %2852  ;;  %v854_v45 = vpop.xlane.xlu1 %853  ;;  %2580 = vmatprep.mubr.f32.mxu1 %v1099_v53  ;;  %v1068_v33 = vadd.f32 %v3628_v17, %v1030_v0  ;;  %v994_v11 = vmul.f32 %v2851_v34, %v3451_v63 }
 0x2fa   :  { %v856_v52 = vpop.xlane.xlu0 %855  ;;  %2862 = vrsqrt.f32 %v936_v42  ;;  %v906_v9 = vmul.f32 0.0078125, %v854_v45  ;;  %v1069_v43 = vadd.f32 %v3628_v17, %v1031_v18  ;;  %v995_v32 = vmul.f32 %v2853_v37, %v3454_v2 }
 0x2fb   :  { %v907_v15 = vmul.f32 0.0078125, %v856_v52  ;;  %2864 = vrsqrt.f32 %v937_v35  ;;  %v1100_v47 = vmax.f32 %v1068_v33, 0.0  ;;  %v1032_v58 = vmul.f32 %v3622_v29, %v994_v11 }
 0x2fc   :  { %v2855_v40 = vpop.eup %2854  ;;  %v938_v49 = vadd.f32 1e-05, %v906_v9  ;;  %v1101_v1 = vmax.f32 %v1069_v43, 0.0  ;;  %v1033_v12 = vmul.f32 %v3622_v29, %v995_v32 }
 0x2fd   :  { %v939_v10 = vadd.f32 1e-05, %v907_v15  ;;  %v2857_v20 = vpop.eup %2856  ;;  %v858_v8 = vpop.xlane.xlu1 %857  ;;  %2581 = vmatmul.mubr.f32.vlgmr.msra.gmra.mrb[24].mxu1 %v1100_v47  ;;  %v1070_v63 = vadd.f32 %v3628_v17, %v1032_v58  ;;  %v996_v7 = vmul.f32 %v2855_v40, %v3461_v16 }
 0x2fe   :  { %v860_v5 = vpop.xlane.xlu0 %859  ;;  %2866 = vrsqrt.f32 %v938_v49  ;;  %v908_v14 = vmul.f32 0.0078125, %v858_v8  ;;  %2583 = vmatprep.mubr.f32.mxu1 %v1101_v1  ;;  %v997_v2 = vmul.f32 %v2857_v20, %v3464_v56  ;;  %v1071_v39 = vadd.f32 %v3628_v17, %v1033_v12 }
 0x2ff   :  { %v909_v19 = vmul.f32 0.0078125, %v860_v5  ;;  %2868 = vrsqrt.f32 %v939_v10  ;;  %v1102_v25 = vmax.f32 %v1070_v63, 0.0  ;;  %v1034_v26 = vmul.f32 %v3622_v29, %v996_v7 }
 0x300   :  { %v2859_v27 = vpop.eup %2858  ;;  %v940_v30 = vadd.f32 1e-05, %v908_v14  ;;  %v1035_v0 = vmul.f32 %v3622_v29, %v997_v2  ;;  %v1103_v35 = vmax.f32 %v1071_v39, 0.0 }
 0x301   :  { %v941_v53 = vadd.f32 1e-05, %v909_v19  ;;  %v2861_v34 = vpop.eup %2860  ;;  %v862_v42 = vpop.xlane.xlu1 %861  ;;  %2584 = vmatmul.mubr.f32.gmra.mrb[26].mxu1 %v1102_v25  ;;  %v1072_v18 = vadd.f32 %v3628_v17, %v1034_v26  ;;  %v998_v56 = vmul.f32 %v2859_v27, %v3471_v31 }
 0x302   :  { %v864_v16 = vpop.xlane.xlu0 %863  ;;  %2870 = vrsqrt.f32 %v940_v30  ;;  %v910_v37 = vmul.f32 0.0078125, %v862_v42  ;;  %v1073_v52 = vadd.f32 %v3628_v17, %v1035_v0  ;;  %2586 = vmatprep.mubr.f32.mxu1 %v1103_v35  ;;  %v999_v9 = vmul.f32 %v2861_v34, %v3474_v60 }
 0x303   :  { %v911_v45 = vmul.f32 0.0078125, %v864_v16  ;;  %2872 = vrsqrt.f32 %v941_v53  ;;  %v1104_v33 = vmax.f32 %v1072_v18, 0.0  ;;  %v1036_v11 = vmul.f32 %v3622_v29, %v998_v56 }
 0x304   :  { %v2863_v15 = vpop.eup %2862  ;;  %v942_v43 = vadd.f32 1e-05, %v910_v37  ;;  %v1105_v58 = vmax.f32 %v1073_v52, 0.0  ;;  %v1037_v10 = vmul.f32 %v3622_v29, %v999_v9 }
 0x305   :  { %v943_v47 = vadd.f32 1e-05, %v911_v45  ;;  %v2865_v32 = vpop.eup %2864  ;;  %v866_v40 = vpop.xlane.xlu1 %865  ;;  %2587 = vmatmul.mubr.f32.gmra.mrb[28].mxu1 %v1104_v33  ;;  %v1074_v49 = vadd.f32 %v3628_v17, %v1036_v11  ;;  %v1000_v1 = vmul.f32 %v2863_v15, %v3481_v38 }
 0x306   :  { %v868_v31 = vpop.xlane.xlu0 %867  ;;  %2874 = vrsqrt.f32 %v942_v43  ;;  %v912_v20 = vmul.f32 0.0078125, %v866_v40  ;;  %2589 = vmatprep.mubr.f32.mxu1 %v1105_v58  ;;  %v1001_v60 = vmul.f32 %v2865_v32, %v3484_v4  ;;  %v1075_v63 = vadd.f32 %v3628_v17, %v1037_v10 }
 0x307   :  { %v913_v8 = vmul.f32 0.0078125, %v868_v31  ;;  %2876 = vrsqrt.f32 %v943_v47  ;;  %v1106_v5 = vmax.f32 %v1074_v49, 0.0  ;;  %v1038_v12 = vmul.f32 %v3622_v29, %v1000_v1 }
 0x308   :  { %v2867_v7 = vpop.eup %2866  ;;  %v944_v14 = vadd.f32 1e-05, %v912_v20  ;;  %v1039_v2 = vmul.f32 %v3622_v29, %v1001_v60  ;;  %v1107_v26 = vmax.f32 %v1075_v63, 0.0 }
 0x309   :  { %v945_v19 = vadd.f32 1e-05, %v913_v8  ;;  %v2869_v25 = vpop.eup %2868  ;;  %v870_v39 = vpop.xlane.xlu1 %869  ;;  %2590 = vmatmul.mubr.f32.gmra.mrb[30].mxu1 %v1106_v5  ;;  %v1076_v27 = vadd.f32 %v3628_v17, %v1038_v12  ;;  %v1002_v4 = vmul.f32 %v2867_v7, %v3497_v13 }
 0x30a   :  { %v872_v38 = vpop.xlane.xlu0 %871  ;;  %2878 = vrsqrt.f32 %v944_v14  ;;  %v914_v30 = vmul.f32 0.0078125, %v870_v39  ;;  %v1077_v0 = vadd.f32 %v3628_v17, %v1039_v2  ;;  %2592 = vmatprep.mubr.f32.mxu1 %v1107_v26  ;;  %v1003_v16 = vmul.f32 %v2869_v25, %v3500_v46 }
 0x30b   :  { %v915_v53 = vmul.f32 0.0078125, %v872_v38  ;;  %2880 = vrsqrt.f32 %v945_v19  ;;  %v1108_v34 = vmax.f32 %v1076_v27, 0.0  ;;  %v1040_v42 = vmul.f32 %v3622_v29, %v1002_v4 }
 0x30c   :  { %v2871_v35 = vpop.eup %2870  ;;  %v946_v18 = vadd.f32 1e-05, %v914_v30  ;;  %v1109_v37 = vmax.f32 %v1077_v0, 0.0  ;;  %v1041_v11 = vmul.f32 %v3622_v29, %v1003_v16 }
 0x30d   :  { %v947_v56 = vadd.f32 1e-05, %v915_v53  ;;  %v2873_v45 = vpop.eup %2872  ;;  %v874_v52 = vpop.xlane.xlu1 %873  ;;  %2593 = vmatmul.mubr.f32.gmra.mrb[32].mxu1 %v1108_v34  ;;  %v1078_v33 = vadd.f32 %v3628_v17, %v1040_v42  ;;  %v1004_v9 = vmul.f32 %v2871_v35, %v3507_v36 }
 0x30e   :  { %v876_v13 = vpop.xlane.xlu0 %875  ;;  %2882 = vrsqrt.f32 %v946_v18  ;;  %v916_v15 = vmul.f32 0.0078125, %v874_v52  ;;  %2595 = vmatprep.mubr.f32.mxu1 %v1109_v37  ;;  %v1005_v46 = vmul.f32 %v2873_v45, %v3510_v21  ;;  %v1079_v58 = vadd.f32 %v3628_v17, %v1041_v11 }
 0x30f   :  { %v917_v43 = vmul.f32 0.0078125, %v876_v13  ;;  %2884 = vrsqrt.f32 %v947_v56  ;;  %v1110_v47 = vmax.f32 %v1078_v33, 0.0  ;;  %v1042_v32 = vmul.f32 %v3622_v29, %v1004_v9 }
 0x310   :  { %v2875_v40 = vpop.eup %2874  ;;  %v948_v31 = vadd.f32 1e-05, %v916_v15  ;;  %v1043_v10 = vmul.f32 %v3622_v29, %v1005_v46  ;;  %v1111_v8 = vmax.f32 %v1079_v58, 0.0 }
 0x311   :  { %v949_v49 = vadd.f32 1e-05, %v917_v43  ;;  %v2877_v1 = vpop.eup %2876  ;;  %v878_v20 = vpop.xlane.xlu1 %877  ;;  %2596 = vmatmul.mubr.f32.gmra.mrb[34].mxu1 %v1110_v47  ;;  %v1080_v60 = vadd.f32 %v3628_v17, %v1042_v32  ;;  %v1006_v21 = vmul.f32 %v2875_v40, %v3523_v57 }
 0x312   :  { %v880_v36 = vpop.xlane.xlu0 %879  ;;  %2886 = vrsqrt.f32 %v948_v31  ;;  %v918_v5 = vmul.f32 0.0078125, %v878_v20  ;;  %v1081_v12 = vadd.f32 %v3628_v17, %v1043_v10  ;;  %2598 = vmatprep.mubr.f32.mxu1 %v1111_v8  ;;  %v1007_v19 = vmul.f32 %v2877_v1, %v3526_v28 }
 0x313   :  { %v919_v63 = vmul.f32 0.0078125, %v880_v36  ;;  %2888 = vrsqrt.f32 %v949_v49  ;;  %v1112_v7 = vmax.f32 %v1080_v60, 0.0  ;;  %v1044_v14 = vmul.f32 %v3622_v29, %v1006_v21 }
 0x314   :  { %v2879_v2 = vpop.eup %2878  ;;  %v950_v25 = vadd.f32 1e-05, %v918_v5  ;;  %v1113_v38 = vmax.f32 %v1081_v12, 0.0  ;;  %v1045_v30 = vmul.f32 %v3622_v29, %v1007_v19 }
 0x315   :  { %v951_v39 = vadd.f32 1e-05, %v919_v63  ;;  %v2881_v26 = vpop.eup %2880  ;;  %v882_v27 = vpop.xlane.xlu1 %881  ;;  %2599 = vmatmul.mubr.f32.gmra.mrb[36].mxu1 %v1112_v7  ;;  %v1082_v4 = vadd.f32 %v3628_v17, %v1044_v14  ;;  %v1008_v53 = vmul.f32 %v2879_v2, %v3539_v24 }
 0x316   :  { %v884_v57 = vpop.xlane.xlu0 %883  ;;  %2890 = vrsqrt.f32 %v950_v25  ;;  %v920_v0 = vmul.f32 0.0078125, %v882_v27  ;;  %2601 = vmatprep.mubr.f32.mxu1 %v1113_v38  ;;  %v1009_v28 = vmul.f32 %v2881_v26, %v3542_v41  ;;  %v1083_v16 = vadd.f32 %v3628_v17, %v1045_v30 }
 0x317   :  { %v921_v34 = vmul.f32 0.0078125, %v884_v57  ;;  %2892 = vrsqrt.f32 %v951_v39  ;;  %v1114_v42 = vmax.f32 %v1082_v4, 0.0  ;;  %v1046_v35 = vmul.f32 %v3622_v29, %v1008_v53 }
 0x318   :  { %v2883_v18 = vpop.eup %2882  ;;  %v952_v56 = vadd.f32 1e-05, %v920_v0  ;;  %v1047_v45 = vmul.f32 %v3622_v29, %v1009_v28  ;;  %v1115_v33 = vmax.f32 %v1083_v16, 0.0 }
 0x319   :  { %v953_v37 = vadd.f32 1e-05, %v921_v34  ;;  %v2885_v52 = vpop.eup %2884  ;;  %v886_v13 = vpop.xlane.xlu1 %885  ;;  %2602 = vmatmul.mubr.f32.gmra.mrb[38].mxu1 %v1114_v42  ;;  %v1084_v11 = vadd.f32 %v3628_v17, %v1046_v35  ;;  %v1010_v41 = vmul.f32 %v2883_v18, %v3555_v48 }
 0x31a   :  { %v888_v24 = vpop.xlane.xlu0 %887  ;;  %2894 = vrsqrt.f32 %v952_v56  ;;  %v922_v9 = vmul.f32 0.0078125, %v886_v13  ;;  %v1085_v43 = vadd.f32 %v3628_v17, %v1047_v45  ;;  %2604 = vmatprep.mubr.f32.mxu1 %v1115_v33  ;;  %v1011_v58 = vmul.f32 %v2885_v52, %v3558_v54 }
 0x31b   :  { %v923_v15 = vmul.f32 0.0078125, %v888_v24  ;;  %2896 = vrsqrt.f32 %v953_v37  ;;  %v1116_v46 = vmax.f32 %v1084_v11, 0.0  ;;  %v1048_v47 = vmul.f32 %v3622_v29, %v1010_v41 }
 0x31c   :  { %v2887_v32 = vpop.eup %2886  ;;  %v954_v40 = vadd.f32 1e-05, %v922_v9  ;;  %v1117_v49 = vmax.f32 %v1085_v43, 0.0  ;;  %v1049_v36 = vmul.f32 %v3622_v29, %v1011_v58 }
 0x31d   :  { %v955_v31 = vadd.f32 1e-05, %v923_v15  ;;  %v2889_v10 = vpop.eup %2888  ;;  %v890_v1 = vpop.xlane.xlu1 %889  ;;  %2605 = vmatmul.mubr.f32.gmra.mrb[40].mxu1 %v1116_v46  ;;  %v1086_v20 = vadd.f32 %v3628_v17, %v1048_v47  ;;  %v1012_v8 = vmul.f32 %v2887_v32, %v3565_v51 }
 0x31e   :  { %v892_v48 = vpop.xlane.xlu0 %891  ;;  %2898 = vrsqrt.f32 %v954_v40  ;;  %v924_v60 = vmul.f32 0.0078125, %v890_v1  ;;  %2607 = vmatprep.mubr.f32.mxu1 %v1117_v49  ;;  %v1013_v54 = vmul.f32 %v2889_v10, %v3568_v50  ;;  %v1087_v63 = vadd.f32 %v3628_v17, %v1049_v36 }
 0x31f   :  { %v925_v21 = vmul.f32 0.0078125, %v892_v48  ;;  %2900 = vrsqrt.f32 %v955_v31  ;;  %v1118_v5 = vmax.f32 %v1086_v20, 0.0  ;;  %v1050_v12 = vmul.f32 %v3622_v29, %v1012_v8 }
 0x320   :  { %v2891_v7 = vpop.eup %2890  ;;  %v956_v14 = vadd.f32 1e-05, %v924_v60  ;;  %v1051_v2 = vmul.f32 %v3622_v29, %v1013_v54  ;;  %v1119_v51 = vmax.f32 %v1087_v63, 0.0 }
 0x321   :  { %v957_v19 = vadd.f32 1e-05, %v925_v21  ;;  %v2893_v25 = vpop.eup %2892  ;;  %v894_v39 = vpop.xlane.xlu1 %893  ;;  %2608 = vmatmul.mubr.f32.gmra.mrb[42].mxu1 %v1118_v5  ;;  %v1088_v38 = vadd.f32 %v3628_v17, %v1050_v12  ;;  %v1014_v26 = vmul.f32 %v2891_v7, %v3575_v23  ;;  %v3728_v21 = vld [vmem:[%s4302_s6] ss:$0 sm:$0xff] }
 0x322   :  { %2902 = vrsqrt.f32 %v956_v14  ;;  %v926_v50 = vmul.f32 0.0078125, %v894_v39  ;;  %v1089_v27 = vadd.f32 %v3628_v17, %v1051_v2  ;;  %v1015_v57 = vmul.f32 %v2893_v25, %v3578_v55  ;;  %2610 = vmatprep.mubr.f32.mxu1 %v1119_v51 }
 0x323   :  { %2904 = vrsqrt.f32 %v957_v19  ;;  %v1120_v4 = vmax.f32 %v1088_v38, 0.0  ;;  %v1052_v30 = vmul.f32 %v3622_v29, %v1014_v26 }
 0x324   :  { %v2895_v53 = vpop.eup %2894  ;;  %v958_v0 = vadd.f32 1e-05, %v926_v50  ;;  %v1121_v34 = vmax.f32 %v1089_v27, 0.0  ;;  %v1053_v28 = vmul.f32 %v3622_v29, %v1015_v57 }
 0x325   :  { %v2897_v42 = vpop.eup %2896  ;;  %2611 = vmatmul.mubr.f32.gmra.mrb[44].mxu1 %v1120_v4  ;;  %v1090_v23 = vadd.f32 %v3628_v17, %v1052_v30  ;;  %v1016_v16 = vmul.f32 %v2895_v53, %v3585_v6 }
 0x326   :  { %2906 = vrsqrt.f32 %v958_v0  ;;  %2613 = vmatprep.mubr.f32.mxu1 %v1121_v34  ;;  %v1091_v55 = vadd.f32 %v3628_v17, %v1053_v28  ;;  %v1017_v35 = vmul.f32 %v2897_v42, %v3588_v59 }
 0x327   :  { %v1122_v18 = vmax.f32 %v1090_v23, 0.0  ;;  %v1054_v56 = vmul.f32 %v3622_v29, %v1016_v16 }
 0x328   :  { %v2899_v37 = vpop.eup %2898  ;;  %v1123_v45 = vmax.f32 %v1091_v55, 0.0  ;;  %v1055_v52 = vmul.f32 %v3622_v29, %v1017_v35 }
 0x329   :  { %v2901_v13 = vpop.eup %2900  ;;  %2614 = vmatmul.mubr.f32.gmra.mrb[46].mxu1 %v1122_v18  ;;  %v1092_v24 = vadd.f32 %v3628_v17, %v1054_v56  ;;  %v1018_v33 = vmul.f32 %v2899_v37, %v3595_v61 }
 0x32a   :  { %2616 = vmatprep.mubr.f32.mxu1 %v1123_v45  ;;  %v1093_v6 = vadd.f32 %v3628_v17, %v1055_v52  ;;  %v1019_v11 = vmul.f32 %v2901_v13, %v3598_v62 }
 0x32b   :  { %v1124_v41 = vmax.f32 %v1092_v24, 0.0  ;;  %v1056_v59 = vmul.f32 %v3622_v29, %v1018_v33 }
 0x32c   :  { %v2903_v9 = vpop.eup %2902  ;;  %v1125_v15 = vmax.f32 %v1093_v6, 0.0  ;;  %v1057_v43 = vmul.f32 %v3622_v29, %v1019_v11 }
 0x32d   :  { %v2905_v46 = vpop.eup %2904  ;;  %2617 = vmatmul.mubr.f32.gmra.mrb[48].mxu1 %v1124_v41  ;;  %v1094_v47 = vadd.f32 %v3628_v17, %v1056_v59  ;;  %v1020_v58 = vmul.f32 %v2903_v9, %v3608_v3 }
 0x32e   :  { %2619 = vmatprep.mubr.f32.mxu1 %v1125_v15  ;;  %v1095_v61 = vadd.f32 %v3628_v17, %v1057_v43  ;;  %v1021_v32 = vmul.f32 %v2905_v46, %v3605_v44 }
 0x32f   :  { %v1126_v40 = vmax.f32 %v1094_v47, 0.0  ;;  %v1058_v62 = vmul.f32 %v3622_v29, %v1020_v58 }
 0x330   :  { %v2907_v31 = vpop.eup %2906  ;;  %v1127_v49 = vmax.f32 %v1095_v61, 0.0  ;;  %v1059_v10 = vmul.f32 %v3622_v29, %v1021_v32 }
 0x331   :  { %2620 = vmatmul.mubr.f32.gmra.mrb[50].mxu1 %v1126_v40  ;;  %v1096_v1 = vadd.f32 %v3628_v17, %v1058_v62  ;;  %v1022_v48 = vmul.f32 %v2907_v31, %v3615_v22 }
 0x332   :  { %2622 = vmatprep.mubr.f32.mxu1 %v1127_v49  ;;  %v1097_v3 = vadd.f32 %v3628_v17, %v1059_v10 }
 0x333   :  { %v1128_v20 = vmax.f32 %v1096_v1, 0.0  ;;  %v1060_v36 = vmul.f32 %v3622_v29, %v1022_v48 }
 0x334   :  { %v1129_v8 = vmax.f32 %v1097_v3, 0.0 }
 0x335   :  { %2623 = vmatmul.mubr.f32.gmra.mrb[52].mxu1 %v1128_v20  ;;  %v1098_v44 = vadd.f32 %v3628_v17, %v1060_v36 }
 0x336   :  { %2625 = vmatprep.mubr.f32.mxu1 %v1129_v8 }
 0x337   :  { %v1130_v60 = vmax.f32 %v1098_v44, 0.0 }
 0x339   :  { %2626 = vmatmul.mubr.f32.gmra.mrb[54].mxu1 %v1130_v60 }
 0x3d0   :  { %v2582_v54 = vpop.f32.mrb[24].mxu1 }
 0x3d1   :  { %v3731_v22 = vadd.f32 %v2582_v54, %v3728_v21  ;;  %v1220_v5 = vpop.f32.mrb[25].mxu1 }
 0x3d2   :  { %v3734_v29 = vadd.f32 %v3728_v21, %v1220_v5 }
 0x3d3   :  { %v1385_v17 = vsel %vm1381_vm0, %v3731_v22, 0.0 }
 0x3d4   :  { %1386 = vadd.xlane.f32.xlu1 %v1385_v17  ;;  %v2585_v63 = vpop.f32.mrb[26].mxu1  ;;  %v1382_v12 = vsel %vm1381_vm0, %v3734_v29, 0.0 }
 0x3d5   :  { %v3741_v7 = vadd.f32 %v2585_v63, %v3728_v21  ;;  %1383 = vadd.xlane.f32.xlu0 %v1382_v12  ;;  %v1230_v14 = vpop.f32.mrb[27].mxu1 }
 0x3d6   :  { %v3744_v19 = vadd.f32 %v3728_v21, %v1230_v14 }
 0x3d7   :  { %v1391_v2 = vsel %vm1381_vm0, %v3741_v7, 0.0 }
 0x3d8   :  { %1392 = vadd.xlane.f32.xlu1 %v1391_v2  ;;  %v2588_v25 = vpop.f32.mrb[28].mxu1  ;;  %v1388_v39 = vsel %vm1381_vm0, %v3744_v19, 0.0 }
 0x3d9   :  { %v3751_v51 = vadd.f32 %v2588_v25, %v3728_v21  ;;  %1389 = vadd.xlane.f32.xlu0 %v1388_v39  ;;  %v1240_v38 = vpop.f32.mrb[29].mxu1 }
 0x3da   :  { %v3754_v26 = vadd.f32 %v3728_v21, %v1240_v38 }
 0x3db   :  { %v1397_v50 = vsel %vm1381_vm0, %v3751_v51, 0.0 }
 0x3dc   :  { %1398 = vadd.xlane.f32.xlu1 %v1397_v50  ;;  %v2591_v27 = vpop.f32.mrb[30].mxu1  ;;  %v1394_v57 = vsel %vm1381_vm0, %v3754_v26, 0.0 }
 0x3dd   :  { %v3761_v4 = vadd.f32 %v2591_v27, %v3728_v21  ;;  %1395 = vadd.xlane.f32.xlu0 %v1394_v57  ;;  %v1250_v30 = vpop.f32.mrb[31].mxu1 }
 0x3de   :  { %v3764_v53 = vadd.f32 %v3728_v21, %v1250_v30 }
 0x3df   :  { %v1403_v0 = vsel %vm1381_vm0, %v3761_v4, 0.0 }
 0x3e0   :  { %1404 = vadd.xlane.f32.xlu1 %v1403_v0  ;;  %v2594_v34 = vpop.f32.mrb[32].mxu1  ;;  %v1400_v28 = vsel %vm1381_vm0, %v3764_v53, 0.0 }
 0x3e1   :  { %v3771_v42 = vadd.f32 %v2594_v34, %v3728_v21  ;;  %1401 = vadd.xlane.f32.xlu0 %v1400_v28  ;;  %v1260_v23 = vpop.f32.mrb[33].mxu1 }
 0x3e2   :  { %v3774_v16 = vadd.f32 %v3728_v21, %v1260_v23 }
 0x3e3   :  { %v1409_v55 = vsel %vm1381_vm0, %v3771_v42, 0.0 }
 0x3e4   :  { %1410 = vadd.xlane.f32.xlu1 %v1409_v55  ;;  %v2597_v35 = vpop.f32.mrb[34].mxu1  ;;  %v1406_v18 = vsel %vm1381_vm0, %v3774_v16, 0.0 }
 0x3e5   :  { %v3781_v56 = vadd.f32 %v2597_v35, %v3728_v21  ;;  %1407 = vadd.xlane.f32.xlu0 %v1406_v18  ;;  %v1270_v37 = vpop.f32.mrb[35].mxu1 }
 0x3e6   :  { %v3784_v45 = vadd.f32 %v3728_v21, %v1270_v37 }
 0x3e7   :  { %v1415_v52 = vsel %vm1381_vm0, %v3781_v56, 0.0 }
 0x3e8   :  { %1416 = vadd.xlane.f32.xlu1 %v1415_v52  ;;  %v2600_v13 = vpop.f32.mrb[36].mxu1  ;;  %v1412_v24 = vsel %vm1381_vm0, %v3784_v45, 0.0 }
 0x3e9   :  { %v3791_v33 = vadd.f32 %v2600_v13, %v3728_v21  ;;  %1413 = vadd.xlane.f32.xlu0 %v1412_v24  ;;  %v1280_v6 = vpop.f32.mrb[37].mxu1 }
 0x3ea   :  { %v3794_v11 = vadd.f32 %v3728_v21, %v1280_v6 }
 0x3eb   :  { %v1421_v41 = vsel %vm1381_vm0, %v3791_v33, 0.0 }
 0x3ec   :  { %1422 = vadd.xlane.f32.xlu1 %v1421_v41  ;;  %v2603_v59 = vpop.f32.mrb[38].mxu1  ;;  %v1418_v9 = vsel %vm1381_vm0, %v3794_v11, 0.0 }
 0x3ed   :  { %v3801_v15 = vadd.f32 %v2603_v59, %v3728_v21  ;;  %1419 = vadd.xlane.f32.xlu0 %v1418_v9  ;;  %v1290_v43 = vpop.f32.mrb[39].mxu1 }
 0x3ee   :  { %v3804_v46 = vadd.f32 %v3728_v21, %v1290_v43 }
 0x3ef   :  { %v1427_v47 = vsel %vm1381_vm0, %v3801_v15, 0.0 }
 0x3f0   :  { %1428 = vadd.xlane.f32.xlu1 %v1427_v47  ;;  %v2606_v58 = vpop.f32.mrb[40].mxu1  ;;  %v1424_v61 = vsel %vm1381_vm0, %v3804_v46, 0.0 }
 0x3f1   :  { %v3811_v32 = vadd.f32 %v2606_v58, %v3728_v21  ;;  %1425 = vadd.xlane.f32.xlu0 %v1424_v61  ;;  %v1300_v40 = vpop.f32.mrb[41].mxu1 }
 0x3f2   :  { %v3814_v62 = vadd.f32 %v3728_v21, %v1300_v40  ;;  %v1907_v40 = vld [vmem:[%s4305_s9] sm:$0xff] }
 0x3f3   :  { %v1433_v31 = vsel %vm1381_vm0, %v3811_v32, 0.0 }
 0x3f4   :  { %1434 = vadd.xlane.f32.xlu1 %v1433_v31  ;;  %v2609_v49 = vpop.f32.mrb[42].mxu1  ;;  %v1430_v10 = vsel %vm1381_vm0, %v3814_v62, 0.0  ;;  %v1908_v31 = vld [vmem:[%s4305_s9 + $0x8] sm:$0xff] }
 0x3f5   :  { %v3821_v1 = vadd.f32 %v2609_v49, %v3728_v21  ;;  %1431 = vadd.xlane.f32.xlu0 %v1430_v10  ;;  %v1310_v48 = vpop.f32.mrb[43].mxu1  ;;  %v2804_v49 = vpack.c.bf16 %v1908_v31, %v1907_v40  ;;  %v1910_v10 = vld [vmem:[%s4305_s9 + $0x18] sm:$0xff] }
 0x3f6   :  { %v3824_v3 = vadd.f32 %v3728_v21, %v1310_v48 }
 0x3f7   :  { %v1439_v20 = vsel %vm1381_vm0, %v3821_v1, 0.0  ;;  %2805 = vmatprep.subr.bf16.mxu1 %v2804_v49 }
 0x3f8   :  { %1440 = vadd.xlane.f32.xlu1 %v1439_v20  ;;  %v2612_v36 = vpop.f32.mrb[44].mxu1  ;;  %v1436_v8 = vsel %vm1381_vm0, %v3824_v3, 0.0  ;;  %v1911_v20 = vld [vmem:[%s4305_s9 + $0x20] sm:$0xff]  ;;  %2807 = vmatpush3.bf16.msra.mxu1 %v2804_v49 }
 0x3f9   :  { %v3831_v44 = vadd.f32 %v2612_v36, %v3728_v21  ;;  %1437 = vadd.xlane.f32.xlu0 %v1436_v8  ;;  %v1320_v60 = vpop.f32.mrb[45].mxu1  ;;  %v1912_v36 = vld [vmem:[%s4305_s9 + $0x28] sm:$0xff] }
 0x3fa   :  { %v3834_v54 = vadd.f32 %v3728_v21, %v1320_v60  ;;  %v2812_v8 = vpack.c.bf16 %v1912_v36, %v1911_v20 }
 0x3fb   :  { %v1445_v5 = vsel %vm1381_vm0, %v3831_v44, 0.0 }
 0x3fc   :  { %1446 = vadd.xlane.f32.xlu1 %v1445_v5  ;;  %v2615_v17 = vpop.f32.mrb[46].mxu1  ;;  %v1442_v63 = vsel %vm1381_vm0, %v3834_v54, 0.0 }
 0x3fd   :  { %v3841_v12 = vadd.f32 %v2615_v17, %v3728_v21  ;;  %1443 = vadd.xlane.f32.xlu0 %v1442_v63  ;;  %v1330_v14 = vpop.f32.mrb[47].mxu1 }
 0x3fe   :  { %v3844_v2 = vadd.f32 %v3728_v21, %v1330_v14 }
 0x3ff   :  { %v1451_v25 = vsel %vm1381_vm0, %v3841_v12, 0.0 }
 0x400   :  { %1452 = vadd.xlane.f32.xlu1 %v1451_v25  ;;  %v2618_v39 = vpop.f32.mrb[48].mxu1  ;;  %v1448_v38 = vsel %vm1381_vm0, %v3844_v2, 0.0 }
 0x401   :  { %v3851_v50 = vadd.f32 %v2618_v39, %v3728_v21  ;;  %1449 = vadd.xlane.f32.xlu0 %v1448_v38  ;;  %v1340_v27 = vpop.f32.mrb[49].mxu1 }
 0x402   :  { %v3854_v57 = vadd.f32 %v3728_v21, %v1340_v27 }
 0x403   :  { %v1457_v30 = vsel %vm1381_vm0, %v3851_v50, 0.0 }
 0x404   :  { %1458 = vadd.xlane.f32.xlu1 %v1457_v30  ;;  %v2621_v0 = vpop.f32.mrb[50].mxu1  ;;  %v1454_v34 = vsel %vm1381_vm0, %v3854_v57, 0.0 }
 0x405   :  { %v3861_v28 = vadd.f32 %v2621_v0, %v3728_v21  ;;  %1455 = vadd.xlane.f32.xlu0 %v1454_v34  ;;  %v1350_v23 = vpop.f32.mrb[51].mxu1 }
 0x406   :  { %v3864_v55 = vadd.f32 %v3728_v21, %v1350_v23 }
 0x407   :  { %v1463_v35 = vsel %vm1381_vm0, %v3861_v28, 0.0 }
 0x408   :  { %1464 = vadd.xlane.f32.xlu1 %v1463_v35  ;;  %v2624_v18 = vpop.f32.mrb[52].mxu1  ;;  %v1460_v37 = vsel %vm1381_vm0, %v3864_v55, 0.0 }
 0x409   :  { %v3871_v52 = vadd.f32 %v2624_v18, %v3728_v21  ;;  %1461 = vadd.xlane.f32.xlu0 %v1460_v37  ;;  %v1360_v13 = vpop.f32.mrb[53].mxu1 }
 0x40a   :  { %v3874_v24 = vadd.f32 %v3728_v21, %v1360_v13 }
 0x40b   :  { %v1469_v6 = vsel %vm1381_vm0, %v3871_v52, 0.0 }
 0x40c   :  { %1470 = vadd.xlane.f32.xlu1 %v1469_v6  ;;  %v2627_v41 = vpop.f32.mrb[54].mxu1  ;;  %v1466_v59 = vsel %vm1381_vm0, %v3874_v24, 0.0 }
 0x40d   :  { %v3881_v9 = vadd.f32 %v2627_v41, %v3728_v21  ;;  %1467 = vadd.xlane.f32.xlu0 %v1466_v59  ;;  %v1370_v43 = vpop.f32.mrb[55].mxu1 }
 0x40e   :  { %v3884_v47 = vadd.f32 %v3728_v21, %v1370_v43  ;;  %v1909_v21 = vld [vmem:[%s4305_s9 + $0x10] sm:$0xff] }
 0x40f   :  { %v1475_v58 = vsel %vm1381_vm0, %v3881_v9, 0.0  ;;  %v2808_v48 = vpack.c.bf16 %v1910_v10, %v1909_v21 }
 0x410   :  { %1476 = vadd.xlane.f32.xlu1 %v1475_v58  ;;  %v1472_v61 = vsel %vm1381_vm0, %v3884_v47, 0.0 }
 0x411   :  { %1473 = vadd.xlane.f32.xlu0 %v1472_v61  ;;  %2809 = vmatprep.subr.bf16.mxu1 %v2808_v48 }
 0x412   :  { %2811 = vmatpush3.bf16.msra.mxu1 %v2808_v48 }
 0x413   :  { %2813 = vmatprep.subr.bf16.mxu1 %v2812_v8 }
 0x416   :  { %2815 = vmatpush3.bf16.msra.mxu1 %v2812_v8 }
 0x461   :  { %v1387_v60 = vpop.xlane.xlu1 %1386 }
 0x462   :  { %v1480_v5 = vmul.f32 0.015625, %v1387_v60  ;;  %v1384_v17 = vpop.xlane.xlu0 %1383 }
 0x463   :  { %v1479_v63 = vmul.f32 0.015625, %v1384_v17 }
 0x464   :  { %v3909_v14 = vsub.f32 %v3731_v22, %v1480_v5 }
 0x465   :  { %v3912_v25 = vsub.f32 %v3734_v29, %v1479_v63  ;;  %v1393_v39 = vpop.xlane.xlu1 %1392 }
 0x466   :  { %v1482_v38 = vmul.f32 0.015625, %v1393_v39  ;;  %v1390_v27 = vpop.xlane.xlu0 %1389  ;;  %v1544_v30 = vmul.f32 %v3909_v14, %v3909_v14 }
 0x467   :  { %v1481_v0 = vmul.f32 0.015625, %v1390_v27  ;;  %v1543_v34 = vmul.f32 %v3912_v25, %v3912_v25 }
 0x468   :  { %v3919_v23 = vsub.f32 %v3741_v7, %v1482_v38  ;;  %v1578_v35 = vsel %vm1381_vm0, %v1544_v30, 0.0 }
 0x469   :  { %v3923_v22 = vsub.f32 %v3744_v19, %v1481_v0  ;;  %v1399_v29 = vpop.xlane.xlu1 %1398  ;;  %1579 = vadd.xlane.f32.xlu1 %v1578_v35  ;;  %v1575_v18 = vsel %vm1381_vm0, %v1543_v34, 0.0 }
 0x46a   :  { %v1484_v37 = vmul.f32 0.015625, %v1399_v29  ;;  %1576 = vadd.xlane.f32.xlu0 %v1575_v18  ;;  %v1396_v13 = vpop.xlane.xlu0 %1395  ;;  %v1546_v6 = vmul.f32 %v3919_v23, %v3919_v23 }
 0x46b   :  { %v1483_v41 = vmul.f32 0.015625, %v1396_v13  ;;  %v1545_v7 = vmul.f32 %v3923_v22, %v3923_v22 }
 0x46c   :  { %v3931_v59 = vsub.f32 %v3751_v51, %v1484_v37  ;;  %v1584_v19 = vsel %vm1381_vm0, %v1546_v6, 0.0 }
 0x46d   :  { %v3935_v43 = vsub.f32 %v3754_v26, %v1483_v41  ;;  %v1405_v58 = vpop.xlane.xlu1 %1404  ;;  %1585 = vadd.xlane.f32.xlu1 %v1584_v19  ;;  %v1581_v61 = vsel %vm1381_vm0, %v1545_v7, 0.0 }
 0x46e   :  { %v1486_v40 = vmul.f32 0.015625, %v1405_v58  ;;  %1582 = vadd.xlane.f32.xlu0 %v1581_v61  ;;  %v1402_v31 = vpop.xlane.xlu0 %1401  ;;  %v1548_v21 = vmul.f32 %v3931_v59, %v3931_v59 }
 0x46f   :  { %v1485_v49 = vmul.f32 0.015625, %v1402_v31  ;;  %v1547_v51 = vmul.f32 %v3935_v43, %v3935_v43 }
 0x470   :  { %v3943_v10 = vsub.f32 %v3761_v4, %v1486_v40  ;;  %v1590_v26 = vsel %vm1381_vm0, %v1548_v21, 0.0 }
 0x471   :  { %v3947_v48 = vsub.f32 %v3764_v53, %v1485_v49  ;;  %v1411_v20 = vpop.xlane.xlu1 %1410  ;;  %1591 = vadd.xlane.f32.xlu1 %v1590_v26  ;;  %v1587_v36 = vsel %vm1381_vm0, %v1547_v51, 0.0 }
 0x472   :  { %v1488_v8 = vmul.f32 0.015625, %v1411_v20  ;;  %1588 = vadd.xlane.f32.xlu0 %v1587_v36  ;;  %v1408_v60 = vpop.xlane.xlu0 %1407  ;;  %v1550_v5 = vmul.f32 %v3943_v10, %v3943_v10 }
 0x473   :  { %v1487_v17 = vmul.f32 0.015625, %v1408_v60  ;;  %v1549_v4 = vmul.f32 %v3947_v48, %v3947_v48 }
 0x474   :  { %v3955_v63 = vsub.f32 %v3771_v42, %v1488_v8  ;;  %v1596_v53 = vsel %vm1381_vm0, %v1550_v5, 0.0 }
 0x475   :  { %v3959_v39 = vsub.f32 %v3774_v16, %v1487_v17  ;;  %v1417_v38 = vpop.xlane.xlu1 %1416  ;;  %1597 = vadd.xlane.f32.xlu1 %v1596_v53  ;;  %v1593_v27 = vsel %vm1381_vm0, %v1549_v4, 0.0 }
 0x476   :  { %v1490_v30 = vmul.f32 0.015625, %v1417_v38  ;;  %1594 = vadd.xlane.f32.xlu0 %v1593_v27  ;;  %v1414_v0 = vpop.xlane.xlu0 %1413  ;;  %v1552_v34 = vmul.f32 %v3955_v63, %v3955_v63 }
 0x477   :  { %v1489_v35 = vmul.f32 0.015625, %v1414_v0  ;;  %v1551_v42 = vmul.f32 %v3959_v39, %v3959_v39 }
 0x478   :  { %v3967_v29 = vsub.f32 %v3781_v56, %v1490_v30  ;;  %v1602_v16 = vsel %vm1381_vm0, %v1552_v34, 0.0 }
 0x479   :  { %v3971_v18 = vsub.f32 %v3784_v45, %v1489_v35  ;;  %v1423_v37 = vpop.xlane.xlu1 %1422  ;;  %1603 = vadd.xlane.f32.xlu1 %v1602_v16  ;;  %v1599_v13 = vsel %vm1381_vm0, %v1551_v42, 0.0 }
 0x47a   :  { %v1492_v6 = vmul.f32 0.015625, %v1423_v37  ;;  %1600 = vadd.xlane.f32.xlu0 %v1599_v13  ;;  %v1420_v41 = vpop.xlane.xlu0 %1419  ;;  %v1554_v7 = vmul.f32 %v3967_v29, %v3967_v29 }
 0x47b   :  { %v1491_v19 = vmul.f32 0.015625, %v1420_v41  ;;  %v1553_v56 = vmul.f32 %v3971_v18, %v3971_v18 }
 0x47c   :  { %v3979_v58 = vsub.f32 %v3791_v33, %v1492_v6  ;;  %v1608_v45 = vsel %vm1381_vm0, %v1554_v7, 0.0 }
 0x47d   :  { %v3983_v61 = vsub.f32 %v3794_v11, %v1491_v19  ;;  %v1429_v40 = vpop.xlane.xlu1 %1428  ;;  %1609 = vadd.xlane.f32.xlu1 %v1608_v45  ;;  %v1605_v31 = vsel %vm1381_vm0, %v1553_v56, 0.0 }
 0x47e   :  { %v1494_v21 = vmul.f32 0.015625, %v1429_v40  ;;  %1606 = vadd.xlane.f32.xlu0 %v1605_v31  ;;  %v1426_v49 = vpop.xlane.xlu0 %1425  ;;  %v1556_v51 = vmul.f32 %v3979_v58, %v3979_v58  ;;  %v1913_v40 = vld [vmem:[%s4305_s9 + $0x30] sm:$0xff] }
 0x47f   :  { %v1493_v26 = vmul.f32 0.015625, %v1426_v49  ;;  %v1555_v33 = vmul.f32 %v3983_v61, %v3983_v61 }
 0x480   :  { %v3991_v20 = vsub.f32 %v3801_v15, %v1494_v21  ;;  %v1614_v11 = vsel %vm1381_vm0, %v1556_v51, 0.0 }
 0x481   :  { %v3995_v36 = vsub.f32 %v3804_v46, %v1493_v26  ;;  %v1435_v8 = vpop.xlane.xlu1 %1434  ;;  %1615 = vadd.xlane.f32.xlu1 %v1614_v11  ;;  %v1611_v60 = vsel %vm1381_vm0, %v1555_v33, 0.0 }
 0x482   :  { %v1496_v5 = vmul.f32 0.015625, %v1435_v8  ;;  %1612 = vadd.xlane.f32.xlu0 %v1611_v60  ;;  %v1432_v17 = vpop.xlane.xlu0 %1431  ;;  %v1558_v4 = vmul.f32 %v3991_v20, %v3991_v20 }
 0x483   :  { %v1495_v53 = vmul.f32 0.015625, %v1432_v17  ;;  %v1557_v15 = vmul.f32 %v3995_v36, %v3995_v36 }
 0x484   :  { %v4003_v38 = vsub.f32 %v3811_v32, %v1496_v5  ;;  %v1620_v46 = vsel %vm1381_vm0, %v1558_v4, 0.0 }
 0x485   :  { %v4007_v27 = vsub.f32 %v3814_v62, %v1495_v53  ;;  %v1441_v30 = vpop.xlane.xlu1 %1440  ;;  %1621 = vadd.xlane.f32.xlu1 %v1620_v46  ;;  %v1617_v0 = vsel %vm1381_vm0, %v1557_v15, 0.0 }
 0x486   :  { %v1498_v34 = vmul.f32 0.015625, %v1441_v30  ;;  %1618 = vadd.xlane.f32.xlu0 %v1617_v0  ;;  %v1438_v35 = vpop.xlane.xlu0 %1437  ;;  %v1560_v42 = vmul.f32 %v4003_v38, %v4003_v38 }
 0x487   :  { %v1497_v16 = vmul.f32 0.015625, %v1438_v35  ;;  %v1559_v32 = vmul.f32 %v4007_v27, %v4007_v27 }
 0x488   :  { %v4015_v37 = vsub.f32 %v3821_v1, %v1498_v34  ;;  %v1626_v62 = vsel %vm1381_vm0, %v1560_v42, 0.0 }
 0x489   :  { %v4019_v13 = vsub.f32 %v3824_v3, %v1497_v16  ;;  %v1447_v6 = vpop.xlane.xlu1 %1446  ;;  %1627 = vadd.xlane.f32.xlu1 %v1626_v62  ;;  %v1623_v41 = vsel %vm1381_vm0, %v1559_v32, 0.0  ;;  %v1914_v3 = vld [vmem:[%s4305_s9 + $0x38] sm:$0xff] }
 0x48a   :  { %v1500_v7 = vmul.f32 0.015625, %v1447_v6  ;;  %1624 = vadd.xlane.f32.xlu0 %v1623_v41  ;;  %v1444_v19 = vpop.xlane.xlu0 %1443  ;;  %v1562_v56 = vmul.f32 %v4015_v37, %v4015_v37  ;;  %v2816_v49 = vpack.c.bf16 %v1914_v3, %v1913_v40 }
 0x48b   :  { %v1499_v45 = vmul.f32 0.015625, %v1444_v19  ;;  %v1561_v1 = vmul.f32 %v4019_v13, %v4019_v13 }
 0x48c   :  { %v4033_v31 = vsub.f32 %v3831_v44, %v1500_v7  ;;  %v1632_v21 = vsel %vm1381_vm0, %v1562_v56, 0.0  ;;  %2817 = vmatprep.subr.bf16.mxu1 %v2816_v49 }
 0x48d   :  { %v4037_v51 = vsub.f32 %v3834_v54, %v1499_v45  ;;  %v1453_v26 = vpop.xlane.xlu1 %1452  ;;  %1633 = vadd.xlane.f32.xlu1 %v1632_v21  ;;  %v1629_v33 = vsel %vm1381_vm0, %v1561_v1, 0.0  ;;  %2819 = vmatpush3.bf16.msra.mxu1 %v2816_v49 }
 0x48e   :  { %v1502_v11 = vmul.f32 0.015625, %v1453_v26  ;;  %1630 = vadd.xlane.f32.xlu0 %v1629_v33  ;;  %v1450_v8 = vpop.xlane.xlu0 %1449  ;;  %v1564_v60 = vmul.f32 %v4033_v31, %v4033_v31 }
 0x48f   :  { %v1501_v5 = vmul.f32 0.015625, %v1450_v8  ;;  %v1563_v44 = vmul.f32 %v4037_v51, %v4037_v51 }
 0x490   :  { %v4045_v17 = vsub.f32 %v3841_v12, %v1502_v11  ;;  %v1638_v54 = vsel %vm1381_vm0, %v1564_v60, 0.0 }
 0x491   :  { %v4049_v4 = vsub.f32 %v3844_v2, %v1501_v5  ;;  %v1459_v53 = vpop.xlane.xlu1 %1458  ;;  %1639 = vadd.xlane.f32.xlu1 %v1638_v54  ;;  %v1635_v15 = vsel %vm1381_vm0, %v1563_v44, 0.0 }
 0x492   :  { %v1504_v46 = vmul.f32 0.015625, %v1459_v53  ;;  %1636 = vadd.xlane.f32.xlu0 %v1635_v15  ;;  %v1456_v30 = vpop.xlane.xlu0 %1455  ;;  %v1566_v0 = vmul.f32 %v4045_v17, %v4045_v17 }
 0x493   :  { %v1503_v34 = vmul.f32 0.015625, %v1456_v30  ;;  %v1565_v12 = vmul.f32 %v4049_v4, %v4049_v4 }
 0x494   :  { %v4057_v35 = vsub.f32 %v3851_v50, %v1504_v46  ;;  %v1644_v2 = vsel %vm1381_vm0, %v1566_v0, 0.0 }
 0x495   :  { %v4061_v42 = vsub.f32 %v3854_v57, %v1503_v34  ;;  %v1465_v16 = vpop.xlane.xlu1 %1464  ;;  %1645 = vadd.xlane.f32.xlu1 %v1644_v2  ;;  %v1641_v32 = vsel %vm1381_vm0, %v1565_v12, 0.0 }
 0x496   :  { %v1506_v62 = vmul.f32 0.015625, %v1465_v16  ;;  %1642 = vadd.xlane.f32.xlu0 %v1641_v32  ;;  %v1462_v6 = vpop.xlane.xlu0 %1461  ;;  %v1568_v41 = vmul.f32 %v4057_v35, %v4057_v35 }
 0x497   :  { %v1505_v7 = vmul.f32 0.015625, %v1462_v6  ;;  %v1567_v50 = vmul.f32 %v4061_v42, %v4061_v42 }
 0x498   :  { %v4069_v19 = vsub.f32 %v3861_v28, %v1506_v62  ;;  %v1650_v57 = vsel %vm1381_vm0, %v1568_v41, 0.0 }
 0x499   :  { %v4073_v56 = vsub.f32 %v3864_v55, %v1505_v7  ;;  %v1471_v45 = vpop.xlane.xlu1 %1470  ;;  %1651 = vadd.xlane.f32.xlu1 %v1650_v57  ;;  %v1647_v1 = vsel %vm1381_vm0, %v1567_v50, 0.0 }
 0x49a   :  { %v1508_v40 = vmul.f32 0.015625, %v1471_v45  ;;  %1648 = vadd.xlane.f32.xlu0 %v1647_v1  ;;  %v1468_v3 = vpop.xlane.xlu0 %1467  ;;  %v1570_v21 = vmul.f32 %v4069_v19, %v4069_v19 }
 0x49b   :  { %v1507_v49 = vmul.f32 0.015625, %v1468_v3  ;;  %v1569_v28 = vmul.f32 %v4073_v56, %v4073_v56 }
 0x49c   :  { %v4081_v26 = vsub.f32 %v3871_v52, %v1508_v40  ;;  %v1656_v55 = vsel %vm1381_vm0, %v1570_v21, 0.0 }
 0x49d   :  { %v4085_v33 = vsub.f32 %v3874_v24, %v1507_v49  ;;  %1657 = vadd.xlane.f32.xlu1 %v1656_v55  ;;  %v1477_v11 = vpop.xlane.xlu1 %1476  ;;  %v1653_v8 = vsel %vm1381_vm0, %v1569_v28, 0.0 }
 0x49e   :  { %v1510_v60 = vmul.f32 0.015625, %v1477_v11  ;;  %1654 = vadd.xlane.f32.xlu0 %v1653_v8  ;;  %v1474_v5 = vpop.xlane.xlu0 %1473  ;;  %v1572_v44 = vmul.f32 %v4081_v26, %v4081_v26 }
 0x49f   :  { %v1509_v54 = vmul.f32 0.015625, %v1474_v5  ;;  %v1571_v52 = vmul.f32 %v4085_v33, %v4085_v33 }
 0x4a0   :  { %v4093_v53 = vsub.f32 %v3881_v9, %v1510_v60  ;;  %v1662_v24 = vsel %vm1381_vm0, %v1572_v44, 0.0  ;;  %v4109_v44 = vld [vmem:[%s4303_s7] ss:$0 sm:$0xff] }
 0x4a1   :  { %v4097_v15 = vsub.f32 %v3884_v47, %v1509_v54  ;;  %1663 = vadd.xlane.f32.xlu1 %v1662_v24  ;;  %v1659_v46 = vsel %vm1381_vm0, %v1571_v52, 0.0 }
 0x4a2   :  { %1660 = vadd.xlane.f32.xlu0 %v1659_v46  ;;  %v1574_v30 = vmul.f32 %v4093_v53, %v4093_v53 }
 0x4a3   :  { %v1573_v0 = vmul.f32 %v4097_v15, %v4097_v15 }
 0x4a4   :  { %v1668_v34 = vsel %vm1381_vm0, %v1574_v30, 0.0 }
 0x4a5   :  { %1669 = vadd.xlane.f32.xlu1 %v1668_v34  ;;  %v1665_v9 = vsel %vm1381_vm0, %v1573_v0, 0.0  ;;  %v4115_v0 = vld [vmem:[%s4304_s8] ss:$0 sm:$0xff] }
 0x4a6   :  { %1666 = vadd.xlane.f32.xlu0 %v1665_v9 }
 0x4f6   :  { %v1580_v12 = vpop.xlane.xlu1 %1579 }
 0x4f7   :  { %v1672_v2 = vmul.f32 0.015625, %v1580_v12  ;;  %v1577_v47 = vpop.xlane.xlu0 %1576 }
 0x4f8   :  { %v1671_v16 = vmul.f32 0.015625, %v1577_v47 }
 0x4f9   :  { %v1704_v32 = vadd.f32 1e-05, %v1672_v2 }
 0x4fa   :  { %v1703_v62 = vadd.f32 1e-05, %v1671_v16  ;;  %v1586_v6 = vpop.xlane.xlu1 %1585 }
 0x4fb   :  { %2908 = vrsqrt.f32 %v1704_v32  ;;  %v1674_v41 = vmul.f32 0.015625, %v1586_v6  ;;  %v1583_v7 = vpop.xlane.xlu0 %1582 }
 0x4fc   :  { %2910 = vrsqrt.f32 %v1703_v62  ;;  %v1673_v50 = vmul.f32 0.015625, %v1583_v7 }
 0x4fd   :  { %v1706_v57 = vadd.f32 1e-05, %v1674_v41 }
 0x4fe   :  { %v1705_v45 = vadd.f32 1e-05, %v1673_v50  ;;  %v1592_v1 = vpop.xlane.xlu1 %1591 }
 0x4ff   :  { %2912 = vrsqrt.f32 %v1706_v57  ;;  %v1676_v40 = vmul.f32 0.015625, %v1592_v1  ;;  %v1589_v3 = vpop.xlane.xlu0 %1588 }
 0x500   :  { %2914 = vrsqrt.f32 %v1705_v45  ;;  %v1675_v21 = vmul.f32 0.015625, %v1589_v3 }
 0x501   :  { %v1708_v49 = vadd.f32 1e-05, %v1676_v40 }
 0x502   :  { %v1707_v28 = vadd.f32 1e-05, %v1675_v21  ;;  %v1598_v55 = vpop.xlane.xlu1 %1597 }
 0x503   :  { %2916 = vrsqrt.f32 %v1708_v49  ;;  %v1678_v11 = vmul.f32 0.015625, %v1598_v55  ;;  %v1595_v8 = vpop.xlane.xlu0 %1594 }
 0x504   :  { %2918 = vrsqrt.f32 %v1707_v28  ;;  %v1677_v60 = vmul.f32 0.015625, %v1595_v8 }
 0x505   :  { %v2909_v5 = vpop.eup %2908  ;;  %v1710_v54 = vadd.f32 1e-05, %v1678_v11 }
 0x506   :  { %v2911_v52 = vpop.eup %2910  ;;  %v1768_v24 = vmul.f32 %v2909_v5, %v3909_v14  ;;  %v1709_v46 = vadd.f32 1e-05, %v1677_v60  ;;  %v1604_v30 = vpop.xlane.xlu1 %1603 }
 0x507   :  { %2920 = vrsqrt.f32 %v1710_v54  ;;  %v1680_v34 = vmul.f32 0.015625, %v1604_v30  ;;  %v1601_v9 = vpop.xlane.xlu0 %1600  ;;  %v1767_v12 = vmul.f32 %v2911_v52, %v3912_v25 }
 0x508   :  { %v1806_v2 = vmul.f32 %v4109_v44, %v1768_v24  ;;  %2922 = vrsqrt.f32 %v1709_v46  ;;  %v1679_v47 = vmul.f32 0.015625, %v1601_v9 }
 0x509   :  { %v2913_v16 = vpop.eup %2912  ;;  %v1712_v32 = vadd.f32 1e-05, %v1680_v34  ;;  %v1805_v14 = vmul.f32 %v4109_v44, %v1767_v12 }
 0x50a   :  { %v2915_v62 = vpop.eup %2914  ;;  %v1844_v6 = vadd.f32 %v4115_v0, %v1806_v2  ;;  %v1711_v41 = vadd.f32 1e-05, %v1679_v47  ;;  %v1610_v7 = vpop.xlane.xlu1 %1609  ;;  %v1770_v50 = vmul.f32 %v2913_v16, %v3919_v23 }
 0x50b   :  { %2924 = vrsqrt.f32 %v1712_v32  ;;  %v1682_v57 = vmul.f32 0.015625, %v1610_v7  ;;  %v1607_v45 = vpop.xlane.xlu0 %1606  ;;  %v1843_v25 = vadd.f32 %v4115_v0, %v1805_v14  ;;  %v1769_v1 = vmul.f32 %v2915_v62, %v3923_v22 }
 0x50c   :  { %2926 = vrsqrt.f32 %v1711_v41  ;;  %v1681_v40 = vmul.f32 0.015625, %v1607_v45  ;;  %v1808_v3 = vmul.f32 %v4109_v44, %v1770_v50  ;;  %v1876_v8 = vmax.f32 %v1844_v6, 0.0 }
 0x50d   :  { %v2917_v21 = vpop.eup %2916  ;;  %v1714_v49 = vadd.f32 1e-05, %v1682_v57  ;;  %v1875_v28 = vmax.f32 %v1843_v25, 0.0  ;;  %v1807_v55 = vmul.f32 %v4109_v44, %v1769_v1 }
 0x50e   :  { %v2919_v11 = vpop.eup %2918  ;;  %v1713_v60 = vadd.f32 1e-05, %v1681_v40  ;;  %v1616_v23 = vpop.xlane.xlu1 %1615  ;;  %v1846_v5 = vadd.f32 %v4115_v0, %v1808_v3  ;;  %v1772_v54 = vmul.f32 %v2917_v21, %v3931_v59 }
 0x50f   :  { %2928 = vrsqrt.f32 %v1714_v49  ;;  %v1684_v52 = vmul.f32 0.015625, %v1616_v23  ;;  %2644 = vmatprep.mubr.msk.f32.mxu1 %vm1381_vm0, %v1875_v28  ;;  %v1613_v22 = vpop.xlane.xlu0 %1612  ;;  %v1845_v24 = vadd.f32 %v4115_v0, %v1807_v55  ;;  %v1771_v46 = vmul.f32 %v2919_v11, %v3935_v43 }
 0x510   :  { %2930 = vrsqrt.f32 %v1713_v60  ;;  %v1683_v30 = vmul.f32 0.015625, %v1613_v22  ;;  %2645 = vmatmul.mubr.msk.f32.vlgmr.msra.gmra.mrb[56].mxu1 %vm1381_vm0, %v1876_v8  ;;  %v1810_v34 = vmul.f32 %v4109_v44, %v1772_v54  ;;  %v1878_v14 = vmax.f32 %v1846_v5, 0.0 }
 0x511   :  { %v2921_v9 = vpop.eup %2920  ;;  %v1716_v12 = vadd.f32 1e-05, %v1684_v52  ;;  %v1877_v2 = vmax.f32 %v1845_v24, 0.0  ;;  %v1809_v59 = vmul.f32 %v4109_v44, %v1771_v46 }
 0x512   :  { %v2923_v47 = vpop.eup %2922  ;;  %v1715_v16 = vadd.f32 1e-05, %v1683_v30  ;;  %v1622_v32 = vpop.xlane.xlu1 %1621  ;;  %v1848_v62 = vadd.f32 %v4115_v0, %v1810_v34  ;;  %v1774_v6 = vmul.f32 %v2921_v9, %v3943_v10 }
 0x513   :  { %2932 = vrsqrt.f32 %v1716_v12  ;;  %v1686_v43 = vmul.f32 0.015625, %v1622_v32  ;;  %2647 = vmatprep.mubr.msk.f32.mxu1 %vm1381_vm0, %v1877_v2  ;;  %v1619_v41 = vpop.xlane.xlu0 %1618  ;;  %v1847_v7 = vadd.f32 %v4115_v0, %v1809_v59  ;;  %v1773_v50 = vmul.f32 %v2923_v47, %v3947_v48 }
 0x514   :  { %2934 = vrsqrt.f32 %v1715_v16  ;;  %v1685_v57 = vmul.f32 0.015625, %v1619_v41  ;;  %2648 = vmatmul.mubr.msk.f32.gmra.mrb[58].mxu1 %vm1381_vm0, %v1878_v14  ;;  %v1812_v45 = vmul.f32 %v4109_v44, %v1774_v6  ;;  %v1880_v28 = vmax.f32 %v1848_v62, 0.0 }
 0x515   :  { %v2925_v25 = vpop.eup %2924  ;;  %v1718_v1 = vadd.f32 1e-05, %v1686_v43  ;;  %v1879_v40 = vmax.f32 %v1847_v7, 0.0  ;;  %v1811_v10 = vmul.f32 %v4109_v44, %v1773_v50 }
 0x516   :  { %v2927_v3 = vpop.eup %2926  ;;  %v1717_v21 = vadd.f32 1e-05, %v1685_v57  ;;  %v1628_v49 = vpop.xlane.xlu1 %1627  ;;  %v1850_v55 = vadd.f32 %v4115_v0, %v1812_v45  ;;  %v1776_v11 = vmul.f32 %v2925_v25, %v3955_v63 }
 0x517   :  { %2936 = vrsqrt.f32 %v1718_v1  ;;  %v1688_v48 = vmul.f32 0.015625, %v1628_v49  ;;  %2650 = vmatprep.mubr.msk.f32.mxu1 %vm1381_vm0, %v1879_v40  ;;  %v1625_v8 = vpop.xlane.xlu0 %1624  ;;  %v1849_v60 = vadd.f32 %v4115_v0, %v1811_v10  ;;  %v1775_v23 = vmul.f32 %v2927_v3, %v3959_v39 }
 0x518   :  { %2938 = vrsqrt.f32 %v1717_v21  ;;  %v1687_v5 = vmul.f32 0.015625, %v1625_v8  ;;  %2651 = vmatmul.mubr.msk.f32.gmra.mrb[60].mxu1 %vm1381_vm0, %v1880_v28  ;;  %v1814_v54 = vmul.f32 %v4109_v44, %v1776_v11  ;;  %v1882_v9 = vmax.f32 %v1850_v55, 0.0 }
 0x519   :  { %v2929_v52 = vpop.eup %2928  ;;  %v1720_v22 = vadd.f32 1e-05, %v1688_v48  ;;  %v1881_v24 = vmax.f32 %v1849_v60, 0.0  ;;  %v1813_v63 = vmul.f32 %v4109_v44, %v1775_v23 }
 0x51a   :  { %v2931_v46 = vpop.eup %2930  ;;  %v1719_v30 = vadd.f32 1e-05, %v1687_v5  ;;  %v1634_v34 = vpop.xlane.xlu1 %1633  ;;  %v1852_v12 = vadd.f32 %v4115_v0, %v1814_v54  ;;  %v1778_v2 = vmul.f32 %v2929_v52, %v3967_v29 }
 0x51b   :  { %2940 = vrsqrt.f32 %v1720_v22  ;;  %v1690_v39 = vmul.f32 0.015625, %v1634_v34  ;;  %2653 = vmatprep.mubr.msk.f32.mxu1 %vm1381_vm0, %v1881_v24  ;;  %v1631_v59 = vpop.xlane.xlu0 %1630  ;;  %v1851_v47 = vadd.f32 %v4115_v0, %v1813_v63  ;;  %v1777_v16 = vmul.f32 %v2931_v46, %v3971_v18 }
 0x51c   :  { %2942 = vrsqrt.f32 %v1719_v30  ;;  %v1689_v32 = vmul.f32 0.015625, %v1631_v59  ;;  %2654 = vmatmul.mubr.msk.f32.gmra.mrb[62].mxu1 %vm1381_vm0, %v1882_v9  ;;  %v1816_v14 = vmul.f32 %v4109_v44, %v1778_v2  ;;  %v1884_v57 = vmax.f32 %v1852_v12, 0.0 }
 0x51d   :  { %v2933_v62 = vpop.eup %2932  ;;  %v1722_v6 = vadd.f32 1e-05, %v1690_v39  ;;  %v1883_v43 = vmax.f32 %v1851_v47, 0.0  ;;  %v1815_v29 = vmul.f32 %v4109_v44, %v1777_v16 }
 0x51e   :  { %v2935_v41 = vpop.eup %2934  ;;  %v1721_v7 = vadd.f32 1e-05, %v1689_v32  ;;  %v1640_v50 = vpop.xlane.xlu1 %1639  ;;  %v1854_v45 = vadd.f32 %v4115_v0, %v1816_v14  ;;  %v1780_v25 = vmul.f32 %v2933_v62, %v3979_v58 }
 0x51f   :  { %2944 = vrsqrt.f32 %v1722_v6  ;;  %v1692_v18 = vmul.f32 0.015625, %v1640_v50  ;;  %2656 = vmatprep.mubr.msk.f32.mxu1 %vm1381_vm0, %v1883_v43  ;;  %v1637_v1 = vpop.xlane.xlu0 %1636  ;;  %v1853_v40 = vadd.f32 %v4115_v0, %v1815_v29  ;;  %v1779_v10 = vmul.f32 %v2935_v41, %v3983_v61 }
 0x520   :  { %2946 = vrsqrt.f32 %v1721_v7  ;;  %v1691_v3 = vmul.f32 0.015625, %v1637_v1  ;;  %2657 = vmatmul.mubr.msk.f32.gmra.mrb[64].mxu1 %vm1381_vm0, %v1884_v57  ;;  %v1818_v21 = vmul.f32 %v4109_v44, %v1780_v25  ;;  %v1886_v60 = vmax.f32 %v1854_v45, 0.0 }
 0x521   :  { %v2937_v49 = vpop.eup %2936  ;;  %v1724_v28 = vadd.f32 1e-05, %v1692_v18  ;;  %v1885_v55 = vmax.f32 %v1853_v40, 0.0  ;;  %v1817_v58 = vmul.f32 %v4109_v44, %v1779_v10 }
 0x522   :  { %v2939_v11 = vpop.eup %2938  ;;  %v1723_v48 = vadd.f32 1e-05, %v1691_v3  ;;  %v1646_v8 = vpop.xlane.xlu1 %1645  ;;  %v1856_v23 = vadd.f32 %v4115_v0, %v1818_v21  ;;  %v1782_v5 = vmul.f32 %v2937_v49, %v3991_v20 }
 0x523   :  { %2948 = vrsqrt.f32 %v1724_v28  ;;  %v1694_v61 = vmul.f32 0.015625, %v1646_v8  ;;  %2659 = vmatprep.mubr.msk.f32.mxu1 %vm1381_vm0, %v1885_v55  ;;  %v1643_v54 = vpop.xlane.xlu0 %1642  ;;  %v1855_v52 = vadd.f32 %v4115_v0, %v1817_v58  ;;  %v1781_v22 = vmul.f32 %v2939_v11, %v3995_v36 }
 0x524   :  { %2950 = vrsqrt.f32 %v1723_v48  ;;  %v1693_v24 = vmul.f32 0.015625, %v1643_v54  ;;  %2660 = vmatmul.mubr.msk.f32.gmra.mrb[66].mxu1 %vm1381_vm0, %v1886_v60  ;;  %v1820_v63 = vmul.f32 %v4109_v44, %v1782_v5  ;;  %v1888_v39 = vmax.f32 %v1856_v23, 0.0 }
 0x525   :  { %v2941_v46 = vpop.eup %2940  ;;  %v1726_v30 = vadd.f32 1e-05, %v1694_v61  ;;  %v1887_v34 = vmax.f32 %v1855_v52, 0.0  ;;  %v1819_v20 = vmul.f32 %v4109_v44, %v1781_v22 }
 0x526   :  { %v2943_v9 = vpop.eup %2942  ;;  %v1725_v12 = vadd.f32 1e-05, %v1693_v24  ;;  %v1652_v2 = vpop.xlane.xlu1 %1651  ;;  %v1858_v59 = vadd.f32 %v4115_v0, %v1820_v63  ;;  %v1784_v47 = vmul.f32 %v2941_v46, %v4003_v38 }
 0x527   :  { %2952 = vrsqrt.f32 %v1726_v30  ;;  %v1696_v36 = vmul.f32 0.015625, %v1652_v2  ;;  %2662 = vmatprep.mubr.msk.f32.mxu1 %vm1381_vm0, %v1887_v34  ;;  %v1649_v16 = vpop.xlane.xlu0 %1648  ;;  %v1857_v32 = vadd.f32 %v4115_v0, %v1819_v20  ;;  %v1783_v14 = vmul.f32 %v2943_v9, %v4007_v27 }
 0x528   :  { %2954 = vrsqrt.f32 %v1725_v12  ;;  %v1695_v62 = vmul.f32 0.015625, %v1649_v16  ;;  %2663 = vmatmul.mubr.msk.f32.gmra.mrb[68].mxu1 %vm1381_vm0, %v1888_v39  ;;  %v1822_v6 = vmul.f32 %v4109_v44, %v1784_v47  ;;  %v1890_v45 = vmax.f32 %v1858_v59, 0.0 }
 0x529   :  { %v2945_v43 = vpop.eup %2944  ;;  %v1728_v29 = vadd.f32 1e-05, %v1696_v36  ;;  %v1889_v41 = vmax.f32 %v1857_v32, 0.0  ;;  %v1821_v38 = vmul.f32 %v4109_v44, %v1783_v14 }
 0x52a   :  { %v2947_v7 = vpop.eup %2946  ;;  %v1727_v50 = vadd.f32 1e-05, %v1695_v62  ;;  %v1658_v57 = vpop.xlane.xlu1 %1657  ;;  %v1860_v25 = vadd.f32 %v4115_v0, %v1822_v6  ;;  %v1786_v18 = vmul.f32 %v2945_v43, %v4015_v37 }
 0x52b   :  { %2956 = vrsqrt.f32 %v1728_v29  ;;  %v1698_v27 = vmul.f32 0.015625, %v1658_v57  ;;  %2665 = vmatprep.mubr.msk.f32.mxu1 %vm1381_vm0, %v1889_v41  ;;  %v1655_v1 = vpop.xlane.xlu0 %1654  ;;  %v1859_v40 = vadd.f32 %v4115_v0, %v1821_v38  ;;  %v1785_v10 = vmul.f32 %v2947_v7, %v4019_v13 }
 0x52c   :  { %2958 = vrsqrt.f32 %v1727_v50  ;;  %v1697_v3 = vmul.f32 0.015625, %v1655_v1  ;;  %2666 = vmatmul.mubr.msk.f32.gmra.mrb[70].mxu1 %vm1381_vm0, %v1890_v45  ;;  %v1824_v21 = vmul.f32 %v4109_v44, %v1786_v18  ;;  %v1892_v8 = vmax.f32 %v1860_v25, 0.0 }
 0x52d   :  { %v2949_v49 = vpop.eup %2948  ;;  %v1730_v28 = vadd.f32 1e-05, %v1698_v27  ;;  %v1891_v55 = vmax.f32 %v1859_v40, 0.0  ;;  %v1823_v37 = vmul.f32 %v4109_v44, %v1785_v10 }
 0x52e   :  { %v2951_v58 = vpop.eup %2950  ;;  %v1729_v11 = vadd.f32 1e-05, %v1697_v3  ;;  %v1664_v48 = vpop.xlane.xlu1 %1663  ;;  %v1862_v60 = vadd.f32 %v4115_v0, %v1824_v21  ;;  %v1788_v23 = vmul.f32 %v2949_v49, %v4033_v31 }
 0x52f   :  { %2960 = vrsqrt.f32 %v1730_v28  ;;  %v1700_v13 = vmul.f32 0.015625, %v1664_v48  ;;  %2668 = vmatprep.mubr.msk.f32.mxu1 %vm1381_vm0, %v1891_v55  ;;  %v1661_v5 = vpop.xlane.xlu0 %1660  ;;  %v1861_v61 = vadd.f32 %v4115_v0, %v1823_v37  ;;  %v1787_v54 = vmul.f32 %v2951_v58, %v4037_v51 }
 0x530   :  { %2962 = vrsqrt.f32 %v1729_v11  ;;  %v1699_v52 = vmul.f32 0.015625, %v1661_v5  ;;  %2669 = vmatmul.mubr.msk.f32.gmra.mrb[72].mxu1 %vm1381_vm0, %v1892_v8  ;;  %v1826_v22 = vmul.f32 %v4109_v44, %v1788_v23  ;;  %v1894_v9 = vmax.f32 %v1862_v60, 0.0 }
 0x531   :  { %v2953_v24 = vpop.eup %2952  ;;  %v1732_v63 = vadd.f32 1e-05, %v1700_v13  ;;  %v1893_v46 = vmax.f32 %v1861_v61, 0.0  ;;  %v1825_v31 = vmul.f32 %v4109_v44, %v1787_v54 }
 0x532   :  { %v2955_v30 = vpop.eup %2954  ;;  %v1731_v34 = vadd.f32 1e-05, %v1699_v52  ;;  %v1670_v20 = vpop.xlane.xlu1 %1669  ;;  %v1864_v12 = vadd.f32 %v4115_v0, %v1826_v22  ;;  %v1790_v2 = vmul.f32 %v2953_v24, %v4045_v17 }
 0x533   :  { %2964 = vrsqrt.f32 %v1732_v63  ;;  %v1702_v51 = vmul.f32 0.015625, %v1670_v20  ;;  %2671 = vmatprep.mubr.msk.f32.mxu1 %vm1381_vm0, %v1893_v46  ;;  %v1667_v39 = vpop.xlane.xlu0 %1666  ;;  %v1863_v59 = vadd.f32 %v4115_v0, %v1825_v31  ;;  %v1789_v47 = vmul.f32 %v2955_v30, %v4049_v4  ;;  %v4247_v31 = vld [vmem:[%s4306_s10] ss:$0 sm:$0xff]  ;;  %s3051_s10 = smov [#allocation7]  }
 0x534   :  { %2966 = vrsqrt.f32 %v1731_v34  ;;  %v1701_v36 = vmul.f32 0.015625, %v1667_v39  ;;  %2672 = vmatmul.mubr.msk.f32.gmra.mrb[74].mxu1 %vm1381_vm0, %v1894_v9  ;;  %v1828_v16 = vmul.f32 %v4109_v44, %v1790_v2  ;;  %v1896_v29 = vmax.f32 %v1864_v12, 0.0  ;;  %s2280_s19 = sshll.u32 %s3051_s10, 4  ;;  %s2281_s19 = int_to_ptr.vmem [resolvable:$true] %s2280_s19 }
 0x535   :  { %v2957_v32 = vpop.eup %2956  ;;  %v1734_v14 = vadd.f32 1e-05, %v1702_v51  ;;  %v1895_v62 = vmax.f32 %v1863_v59, 0.0  ;;  %v1827_v17 = vmul.f32 %v4109_v44, %v1789_v47  ;;  %s3016_s20 = scalar_lea.vmem %s2281_s19, 4096  ;;  %p3021_p3 = scmp.lt.s32.totalorder %s2281_s19, %s2281_s19 }
 0x536   :  { %v2959_v6 = vpop.eup %2958  ;;  %v1733_v43 = vadd.f32 1e-05, %v1701_v36  ;;  %v1866_v41 = vadd.f32 %v4115_v0, %v1828_v16  ;;  %v1792_v38 = vmul.f32 %v2957_v32, %v4057_v35  ;;  %p3017_p2 = scmp.ne.s32.totalorder %s2281_s19, %s3016_s20  ;;  %p3022_p4 = scmp.lt.s32.totalorder %s3016_s20, %s3016_s20 }
 0x537   :  { %2968 = vrsqrt.f32 %v1734_v14  ;;  %2674 = vmatprep.mubr.msk.f32.mxu1 %vm1381_vm0, %v1895_v62  ;;  %v1865_v4 = vadd.f32 %v4115_v0, %v1827_v17  ;;  %v1791_v7 = vmul.f32 %v2959_v6, %v4061_v42 }
 0x538   :  { %2970 = vrsqrt.f32 %v1733_v43  ;;  %2675 = vmatmul.mubr.msk.f32.gmra.mrb[76].mxu1 %vm1381_vm0, %v1896_v29  ;;  %v1830_v50 = vmul.f32 %v4109_v44, %v1792_v38  ;;  %v1898_v27 = vmax.f32 %v1866_v41, 0.0  ;;  %p3023_p5 = por %p3022_p4, %p3021_p3 }
 0x539   :  { %v2961_v57 = vpop.eup %2960  ;;  %v1897_v45 = vmax.f32 %v1865_v4, 0.0  ;;  %v1829_v25 = vmul.f32 %v4109_v44, %v1791_v7 }
 0x53a   :  { %v2963_v18 = vpop.eup %2962  ;;  %v1868_v35 = vadd.f32 %v4115_v0, %v1830_v50  ;;  %v1794_v1 = vmul.f32 %v2961_v57, %v4069_v19  ;;  %p3024_p6 = pnand %p3023_p5, %p3017_p2 }
 0x53b   :  { %2677 = vmatprep.mubr.msk.f32.mxu1 %vm1381_vm0, %v1897_v45  ;;  %v1867_v40 = vadd.f32 %v4115_v0, %v1829_v25  ;;  %v1793_v42 = vmul.f32 %v2963_v18, %v4073_v56 }
 0x53c   :  { %2678 = vmatmul.mubr.msk.f32.gmra.mrb[78].mxu1 %vm1381_vm0, %v1898_v27  ;;  %v1832_v10 = vmul.f32 %v4109_v44, %v1794_v1  ;;  %v1900_v55 = vmax.f32 %v1868_v35, 0.0 }
 0x53d   :  { %v2965_v3 = vpop.eup %2964  ;;  %v1899_v21 = vmax.f32 %v1867_v40, 0.0  ;;  %v1831_v49 = vmul.f32 %v4109_v44, %v1793_v42 }
 0x53e   :  { %v2967_v28 = vpop.eup %2966  ;;  %v1870_v37 = vadd.f32 %v4115_v0, %v1832_v10  ;;  %v1796_v19 = vmul.f32 %v2965_v3, %v4081_v26 }
 0x53f   :  { %2680 = vmatprep.mubr.msk.f32.mxu1 %vm1381_vm0, %v1899_v21  ;;  %v1869_v58 = vadd.f32 %v4115_v0, %v1831_v49  ;;  %v1795_v56 = vmul.f32 %v2967_v28, %v4085_v33 }
 0x540   :  { %2681 = vmatmul.mubr.msk.f32.gmra.mrb[80].mxu1 %vm1381_vm0, %v1900_v55  ;;  %v1834_v11 = vmul.f32 %v4109_v44, %v1796_v19  ;;  %v1902_v5 = vmax.f32 %v1870_v37, 0.0 }
 0x541   :  { %v2969_v48 = vpop.eup %2968  ;;  %v1901_v8 = vmax.f32 %v1869_v58, 0.0  ;;  %v1833_v60 = vmul.f32 %v4109_v44, %v1795_v56 }
 0x542   :  { %v2971_v23 = vpop.eup %2970  ;;  %v1798_v13 = vmul.f32 %v2969_v48, %v4093_v53  ;;  %v1872_v26 = vadd.f32 %v4115_v0, %v1834_v11 }
 0x543   :  { %v1797_v61 = vmul.f32 %v2971_v23, %v4097_v15  ;;  %2683 = vmatprep.mubr.msk.f32.mxu1 %vm1381_vm0, %v1901_v8  ;;  %v1871_v33 = vadd.f32 %v4115_v0, %v1833_v60 }
 0x544   :  { %2684 = vmatmul.mubr.msk.f32.gmra.mrb[82].mxu1 %vm1381_vm0, %v1902_v5  ;;  %v1836_v54 = vmul.f32 %v4109_v44, %v1798_v13  ;;  %v1904_v24 = vmax.f32 %v1872_v26, 0.0 }
 0x545   :  { %v1903_v52 = vmax.f32 %v1871_v33, 0.0  ;;  %v1835_v22 = vmul.f32 %v4109_v44, %v1797_v61 }
 0x546   :  { %v1874_v63 = vadd.f32 %v4115_v0, %v1836_v54 }
 0x547   :  { %2686 = vmatprep.mubr.msk.f32.mxu1 %vm1381_vm0, %v1903_v52  ;;  %v1873_v53 = vadd.f32 %v4115_v0, %v1835_v22 }
 0x548   :  { %2687 = vmatmul.mubr.msk.f32.gmra.mrb[84].mxu1 %vm1381_vm0, %v1904_v24  ;;  %v1906_v46 = vmax.f32 %v1874_v63, 0.0 }
 0x549   :  { %v1905_v15 = vmax.f32 %v1873_v53, 0.0 }
 0x54b   :  { %2689 = vmatprep.mubr.msk.f32.mxu1 %vm1381_vm0, %v1905_v15 }
 0x54c   :  { %2690 = vmatmul.mubr.msk.f32.gmra.mrb[86].mxu1 %vm1381_vm0, %v1906_v46 }
 0x5e3   :  { %v2646_v44 = vpop.f32.mrb[56].mxu1 }
 0x5e4   :  { %v2090_v30 = vadd.f32 %v2646_v44, %v4247_v31  ;;  %v2084_v34 = vpop.f32.mrb[57].mxu1 }
 0x5e5   :  { %v2085_v20 = vadd.f32 %v4247_v31, %v2084_v34 }
 0x5e6   :  { %2244 = vst [vmem:[#allocation7 + $0x8] sm:$0xff] %v2090_v30 }
 0x5e7   :  { %2243 = vst [vmem:[#allocation7] sm:$0xff] %v2085_v20  ;;  %v2649_v0 = vpop.f32.mrb[58].mxu1 }
 0x5e8   :  { %v2100_v9 = vadd.f32 %v2649_v0, %v4247_v31  ;;  %v2094_v12 = vpop.f32.mrb[59].mxu1 }
 0x5e9   :  { %v2095_v2 = vadd.f32 %v4247_v31, %v2094_v12 }
 0x5ea   :  { %2246 = vst [vmem:[#allocation7 + $0x18] sm:$0xff] %v2100_v9 }
 0x5eb   :  { %2245 = vst [vmem:[#allocation7 + $0x10] sm:$0xff] %v2095_v2  ;;  %v2652_v51 = vpop.f32.mrb[60].mxu1 }
 0x5ec   :  { %v2110_v39 = vadd.f32 %v2652_v51, %v4247_v31  ;;  %v2104_v59 = vpop.f32.mrb[61].mxu1 }
 0x5ed   :  { %v2105_v47 = vadd.f32 %v4247_v31, %v2104_v59 }
 0x5ee   :  { %2248 = vst [vmem:[#allocation7 + $0x28] sm:$0xff] %v2110_v39 }
 0x5ef   :  { %2247 = vst [vmem:[#allocation7 + $0x20] sm:$0xff] %v2105_v47  ;;  %v2655_v36 = vpop.f32.mrb[62].mxu1 }
 0x5f0   :  { %v2120_v16 = vadd.f32 %v2655_v36, %v4247_v31  ;;  %v2114_v32 = vpop.f32.mrb[63].mxu1 }
 0x5f1   :  { %v2115_v14 = vadd.f32 %v4247_v31, %v2114_v32 }
 0x5f2   :  { %2250 = vst [vmem:[#allocation7 + $0x38] sm:$0xff] %v2120_v16 }
 0x5f3   :  { %2249 = vst [vmem:[#allocation7 + $0x30] sm:$0xff] %v2115_v14  ;;  %v2658_v62 = vpop.f32.mrb[64].mxu1 }
 0x5f4   :  { %v2130_v17 = vadd.f32 %v2658_v62, %v4247_v31  ;;  %v2124_v6 = vpop.f32.mrb[65].mxu1 }
 0x5f5   :  { %v2125_v43 = vadd.f32 %v4247_v31, %v2124_v6 }
 0x5f6   :  { %2252 = vst [vmem:[#allocation7 + $0x48] sm:$0xff] %v2130_v17 }
 0x5f7   :  { %2251 = vst [vmem:[#allocation7 + $0x40] sm:$0xff] %v2125_v43  ;;  %v2661_v29 = vpop.f32.mrb[66].mxu1 }
 0x5f8   :  { %v2140_v41 = vadd.f32 %v2661_v29, %v4247_v31  ;;  %v2134_v38 = vpop.f32.mrb[67].mxu1 }
 0x5f9   :  { %v2135_v4 = vadd.f32 %v4247_v31, %v2134_v38 }
 0x5fa   :  { %2254 = vst [vmem:[#allocation7 + $0x58] sm:$0xff] %v2140_v41 }
 0x5fb   :  { %2253 = vst [vmem:[#allocation7 + $0x50] sm:$0xff] %v2135_v4  ;;  %v2664_v7 = vpop.f32.mrb[68].mxu1 }
 0x5fc   :  { %v2150_v50 = vadd.f32 %v2664_v7, %v4247_v31  ;;  %v2144_v57 = vpop.f32.mrb[69].mxu1 }
 0x5fd   :  { %v2145_v45 = vadd.f32 %v4247_v31, %v2144_v57 }
 0x5fe   :  { %2256 = vst [vmem:[#allocation7 + $0x68] sm:$0xff] %v2150_v50 }
 0x5ff   :  { %2255 = vst [vmem:[#allocation7 + $0x60] sm:$0xff] %v2145_v45  ;;  %v2667_v25 = vpop.f32.mrb[70].mxu1 }
 0x600   :  { %v2160_v18 = vadd.f32 %v2667_v25, %v4247_v31  ;;  %v2154_v27 = vpop.f32.mrb[71].mxu1 }
 0x601   :  { %v2155_v35 = vadd.f32 %v4247_v31, %v2154_v27 }
 0x602   :  { %2258 = vst [vmem:[#allocation7 + $0x78] sm:$0xff] %v2160_v18 }
 0x603   :  { %2257 = vst [vmem:[#allocation7 + $0x70] sm:$0xff] %v2155_v35  ;;  %v2670_v1 = vpop.f32.mrb[72].mxu1 }
 0x604   :  { %v2170_v40 = vadd.f32 %v2670_v1, %v4247_v31  ;;  %v2164_v42 = vpop.f32.mrb[73].mxu1 }
 0x605   :  { %v2165_v10 = vadd.f32 %v4247_v31, %v2164_v42 }
 0x606   :  { %2260 = vst [vmem:[#allocation7 + $0x88] sm:$0xff] %v2170_v40 }
 0x607   :  { %2259 = vst [vmem:[#allocation7 + $0x80] sm:$0xff] %v2165_v10  ;;  %v2673_v3 = vpop.f32.mrb[74].mxu1 }
 0x608   :  { %v2180_v21 = vadd.f32 %v2673_v3, %v4247_v31  ;;  %v2174_v49 = vpop.f32.mrb[75].mxu1 }
 0x609   :  { %v2175_v28 = vadd.f32 %v4247_v31, %v2174_v49 }
 0x60a   :  { %2262 = vst [vmem:[#allocation7 + $0x98] sm:$0xff] %v2180_v21 }
 0x60b   :  { %2261 = vst [vmem:[#allocation7 + $0x90] sm:$0xff] %v2175_v28  ;;  %v2676_v55 = vpop.f32.mrb[76].mxu1 }
 0x60c   :  { %v2190_v37 = vadd.f32 %v2676_v55, %v4247_v31  ;;  %v2184_v19 = vpop.f32.mrb[77].mxu1 }
 0x60d   :  { %v2185_v58 = vadd.f32 %v4247_v31, %v2184_v19 }
 0x60e   :  { %2264 = vst [vmem:[#allocation7 + $0xa8] sm:$0xff] %v2190_v37 }
 0x60f   :  { %2263 = vst [vmem:[#allocation7 + $0xa0] sm:$0xff] %v2185_v58  ;;  %v2679_v56 = vpop.f32.mrb[78].mxu1 }
 0x610   :  { %v2200_v11 = vadd.f32 %v2679_v56, %v4247_v31  ;;  %v2194_v48 = vpop.f32.mrb[79].mxu1 }
 0x611   :  { %v2195_v8 = vadd.f32 %v4247_v31, %v2194_v48 }
 0x612   :  { %2266 = vst [vmem:[#allocation7 + $0xb8] sm:$0xff] %v2200_v11 }
 0x613   :  { %2265 = vst [vmem:[#allocation7 + $0xb0] sm:$0xff] %v2195_v8  ;;  %v2682_v60 = vpop.f32.mrb[80].mxu1 }
 0x614   :  { %v2210_v23 = vadd.f32 %v2682_v60, %v4247_v31  ;;  %v2204_v13 = vpop.f32.mrb[81].mxu1 }
 0x615   :  { %v2205_v5 = vadd.f32 %v4247_v31, %v2204_v13 }
 0x616   :  { %2268 = vst [vmem:[#allocation7 + $0xc8] sm:$0xff] %v2210_v23 }
 0x617   :  { %2267 = vst [vmem:[#allocation7 + $0xc0] sm:$0xff] %v2205_v5  ;;  %v2685_v26 = vpop.f32.mrb[82].mxu1 }
 0x618   :  { %v2220_v61 = vadd.f32 %v2685_v26, %v4247_v31  ;;  %v2214_v33 = vpop.f32.mrb[83].mxu1 }
 0x619   :  { %v2215_v54 = vadd.f32 %v4247_v31, %v2214_v33 }
 0x61a   :  { %2270 = vst [vmem:[#allocation7 + $0xd8] sm:$0xff] %v2220_v61 }
 0x61b   :  { %2269 = vst [vmem:[#allocation7 + $0xd0] sm:$0xff] %v2215_v54  ;;  %v2688_v52 = vpop.f32.mrb[84].mxu1 }
 0x61c   :  { %v2230_v22 = vadd.f32 %v2688_v52, %v4247_v31  ;;  %v2224_v24 = vpop.f32.mrb[85].mxu1 }
 0x61d   :  { %v2225_v63 = vadd.f32 %v4247_v31, %v2224_v24 }
 0x61e   :  { %2272 = vst [vmem:[#allocation7 + $0xe8] sm:$0xff] %v2230_v22 }
 0x61f   :  { %2271 = vst [vmem:[#allocation7 + $0xe0] sm:$0xff] %v2225_v63  ;;  %v2691_v53 = vpop.f32.mrb[86].mxu1 }
 0x620   :  { %v2240_v15 = vadd.f32 %v2691_v53, %v4247_v31  ;;  %v2234_v46 = vpop.f32.mrb[87].mxu1 }
 0x621   :  { %v2235_v44 = vadd.f32 %v4247_v31, %v2234_v46 }
 0x622   :  { %2274 = vst [vmem:[#allocation7 + $0xf8] sm:$0xff] %v2240_v15 }
 0x623   :  { %2273 = vst [vmem:[#allocation7 + $0xf0] sm:$0xff] %v2235_v44 }
 0x624   :  { %3027 = shalt.err (!%p3024_p6)
}
 0x625   :  { %s3028_s4 = scalar_lea.hbm %s4307_s11, 4096 }
 0x626   :  { %p3029_p7 = scmp.ne.s32.totalorder %s4307_s11, %s3028_s4  ;;  %p3032_p8 = scmp.lt.u32.totalorder %s3028_s4, %s4307_s11 }
 0x628   :  { %p3034_p9 = pnand %p3032_p8, %p3029_p7 }
 0x62a   :  { %3037 = shalt.err (!%p3034_p9)
}
 0x62b   :  { %2286 = dma.vmem_to_hbm [thread:$0]  %s2281_s19, 4096, %s4307_s11, [#allocation4], %s3048_s0, %s3048_s0, %s3049_s18  }
 0x62c   :  { %3042 = dma.done.wait [#allocation4], 4096  }
 0x62d   :  { %3043 = vsyncadd [#allocation4], 4294963200 }
 0x62e   :  { %2290 = vsyncpa [#allocation3], 1 }
 0x62f   :  { %2291 = vsyncpa [#allocation6], 1 }
 0x630   :  { %2292 = vsyncpa [#allocation4], 1 }

</bundles_post_ra>
